<compile_context>
chip_gen: v5e
topology: v5e:2x2
jax: 0.10.0
libtpu: 0.0.40
codegen_flags: <defaults>
</compile_context>

<pallas_src>
import functools

import jax
import jax.numpy as jnp
from jax.experimental import pallas as pl
from jax.experimental.pallas import tpu as pltpu


# ----------------------------- Pallas kernel --------------------------------

def _bottleneck_kernel(x_ref, mask_ref, w1_ref, b1_ref, w2_ref, b2_ref,
                       w3_ref, b3_ref, o_ref, mid_ref, *, H, W):
    """Fused Bottleneck for one image.

    x_ref   : (L_p, Cin_p)  bf16, flattened zero-padded pixel plane
              (L_p = 8-aligned (H+2)*(W+2), extra rows are zero)
    mask_ref: (L_p, 1)      f32, 1 on interior pixels, 0 on padding ring / tail
    w1_ref  : (Cin_p, Cmid_p)     bf16 (BN1 scale folded in)
    w2_ref  : (9, Cmid_p, Cmid_p) bf16 (BN2 scale folded in), tap = kh*3+kw
    w3_ref  : (Cmid_p, Cout_p)    bf16 (BN3 scale folded in)
    b*_ref  : (1, C*) f32 folded BN biases
    o_ref   : (span_p, Cout_p) f32, span_p = 8-aligned (H-1)*(W+2)+W
    mid_ref : (L_p, Cmid_p) bf16 VMEM scratch (conv1 output, zero padding ring)
    """
    Wp = W + 2
    span_p = o_ref.shape[0]          # 8-aligned contiguous output row range
    q0 = Wp + 1                      # flat index of the first interior pixel

    # conv1 (1x1) + bn1 + relu over every padded pixel; the mask zeroes the
    # padding ring (and tail rows) so conv2 sees true zero padding of the
    # *post-activation* map.
    y1 = jnp.dot(x_ref[...], w1_ref[...], preferred_element_type=jnp.float32)
    y1 = jnp.maximum(y1 + b1_ref[...], 0.0) * mask_ref[...]
    mid_ref[...] = y1.astype(jnp.bfloat16)

    # conv2 (3x3, stride 1, pad 1) + bn2 + relu as 9 shifted MXU matmuls on the
    # flattened (L_p, Cmid) map held in VMEM (no HBM im2col round-trip).
    cmid = mid_ref.shape[-1]
    acc = jnp.zeros((span_p, cmid), jnp.float32)
    for kh in range(3):
        for kw in range(3):
            off = q0 + (kh - 1) * Wp + (kw - 1)           # static offset >= 0
            win = mid_ref[pl.ds(off, span_p), :]
            acc += jnp.dot(win, w2_ref[kh * 3 + kw],
                           preferred_element_type=jnp.float32)
    y2 = jnp.maximum(acc + b2_ref[...], 0.0).astype(jnp.bfloat16)

    # conv3 (1x1) + bn3 + identity residual + relu (f32 epilogue).
    y3 = jnp.dot(y2, w3_ref[...], preferred_element_type=jnp.float32)
    res = x_ref[pl.ds(q0, span_p), :].astype(jnp.float32)
    o_ref[...] = jnp.maximum(y3 + b3_ref[...] + res, 0.0).astype(o_ref.dtype)


def _bottleneck_pallas(x_flat, mask, w1, b1, w2, b2, w3, b3, *, H, W, span_p):
    N, L_p, cin_p = x_flat.shape
    cmid_p = w1.shape[1]
    cout_p = w3.shape[1]

    kernel = functools.partial(_bottleneck_kernel, H=H, W=W)

    flops = 2 * N * (L_p * cin_p * cmid_p
                     + 9 * span_p * cmid_p * cmid_p
                     + span_p * cmid_p * cout_p)
    bytes_accessed = (x_flat.size * 2 + mask.size * 4
                      + (w1.size + w2.size + w3.size) * 2
                      + (b1.size + b2.size + b3.size) * 4
                      + N * span_p * cout_p * 4)

    return pl.pallas_call(
        kernel,
        out_shape=jax.ShapeDtypeStruct((N, span_p, cout_p), jnp.float32),
        grid_spec=pltpu.PrefetchScalarGridSpec(
            num_scalar_prefetch=0,
            grid=(N,),
            in_specs=[
                pl.BlockSpec((None, L_p, cin_p), lambda n: (n, 0, 0)),
                pl.BlockSpec((L_p, 1), lambda n: (0, 0)),
                pl.BlockSpec((cin_p, cmid_p), lambda n: (0, 0)),
                pl.BlockSpec((1, cmid_p), lambda n: (0, 0)),
                pl.BlockSpec((9, cmid_p, cmid_p), lambda n: (0, 0, 0)),
                pl.BlockSpec((1, cmid_p), lambda n: (0, 0)),
                pl.BlockSpec((cmid_p, cout_p), lambda n: (0, 0)),
                pl.BlockSpec((1, cout_p), lambda n: (0, 0)),
            ],
            out_specs=pl.BlockSpec((None, span_p, cout_p), lambda n: (n, 0, 0)),
            scratch_shapes=[pltpu.VMEM((L_p, cmid_p), jnp.bfloat16)],
        ),
        compiler_params=pltpu.CompilerParams(
            dimension_semantics=("parallel",),
            # Budget stays well under v7x's 64 MiB physical VMEM even for
            # ResNet-layer1 shapes (per-image block ~15 MiB incl. double
            # buffering of x / out).
            vmem_limit_bytes=48 * 1024 * 1024),
        cost_estimate=pl.CostEstimate(flops=flops, transcendentals=0,
                                      bytes_accessed=bytes_accessed),
    )(x_flat, mask, w1, b1, w2, b2, w3, b3)


# ------------------------------ JAX glue -------------------------------------

def _round_up(v, m):
    return (v + m - 1) // m * m


def _pad_to(a, shape):
    return jnp.pad(a, [(0, t - s) for s, t in zip(a.shape, shape)])


def _fold_bn(gamma, beta, mean, var, eps=1e-5):
    scale = gamma / jnp.sqrt(var + eps)
    bias = beta - mean * scale
    return scale.astype(jnp.float32), bias.astype(jnp.float32)


def bottleneck_forward(x_nchw, params, stride=1):
    """Bottleneck forward (inference BN), identity shortcut configuration.

    params:
      w1: (Cin, planes)            # 1x1 conv, (Cin, Cout) matrix layout
      w2: (3, 3, planes, planes)   # 3x3 conv, (kh, kw, Cin, Cout)
      w3: (planes, planes*4)       # 1x1 conv
      bn{1,2,3}: dict(gamma, beta, mean, var)
    """
    N, C, H, W = x_nchw.shape
    planes = params["w1"].shape[1]
    cout = 4 * planes
    # TODO(synk): downsample branch (a user-supplied nn.Module) and stride>1
    # are not modeled; only the identity-shortcut configuration is supported.
    assert stride == 1 and C == cout, (
        "identity shortcut only: requires stride==1 and inplanes == 4*planes")

    cin_p = _round_up(C, 128)
    cmid_p = _round_up(planes, 128)
    cout_p = _round_up(cout, 128)
    Hp, Wp = H + 2, W + 2
    L = Hp * Wp
    span = (H - 1) * Wp + W
    # 8-aligned row counts: output rows (matmul M) and plane length. The bound
    # L_p >= 2*Wp + 2 + span_p guarantees every shifted conv2 window and the
    # residual slice stay inside the (zero-filled) plane.
    span_p = _round_up(span, 8)
    L_p = _round_up(2 * Wp + 2 + span_p, 8)
    assert L_p >= L

    s1, b1 = _fold_bn(**params["bn1"])
    s2, b2 = _fold_bn(**params["bn2"])
    s3, b3 = _fold_bn(**params["bn3"])

    # Fold BN scales into weight columns (one-time transform), zero-pad channels
    # to lane-dense multiples of 128, cast to bf16 (accumulation stays f32).
    w1 = _pad_to(params["w1"] * s1[None, :], (cin_p, cmid_p)).astype(jnp.bfloat16)
    w2 = _pad_to(params["w2"] * s2[None, None, None, :], (3, 3, cmid_p, cmid_p))
    w2 = w2.reshape(9, cmid_p, cmid_p).astype(jnp.bfloat16)
    w3 = _pad_to(params["w3"] * s3[None, :], (cmid_p, cout_p)).astype(jnp.bfloat16)
    b1p = _pad_to(b1[None, :], (1, cmid_p))
    b2p = _pad_to(b2[None, :], (1, cmid_p))
    b3p = _pad_to(b3[None, :], (1, cout_p))

    # NCHW -> NHWC once at the boundary, pad channels, spatial pad=1, flatten
    # the (Hp, Wp) plane so the kernel indexes pixels as matmul rows, then pad
    # the row axis to L_p (extra rows stay zero).
    # TODO(synk): in a full network keep activations NHWC across blocks and
    # hoist this transpose to model entry/exit.
    x = jnp.transpose(x_nchw, (0, 2, 3, 1))
    x = _pad_to(x, (N, H, W, cin_p))
    x = jnp.pad(x, ((0, 0), (1, 1), (1, 1), (0, 0)))
    x = x.reshape(N, L, cin_p)
    x = _pad_to(x, (N, L_p, cin_p)).astype(jnp.bfloat16)

    # Interior mask over flattened padded pixels (0 on the padding ring and on
    # the alignment tail rows >= L).
    hh = jnp.arange(L_p, dtype=jnp.int32) // Wp
    ww = jnp.arange(L_p, dtype=jnp.int32) % Wp
    mask = ((hh >= 1) & (hh <= H) & (ww >= 1) & (ww <= W) &
            (jnp.arange(L_p, dtype=jnp.int32) < L))
    mask = mask.astype(jnp.float32)[:, None]

    out = _bottleneck_pallas(x, mask, w1, b1p, w2, b2p, w3, b3p,
                             H=H, W=W, span_p=span_p)

    # Rows of `out` are padded-plane flat positions q0..q0+span_p-1 (row r maps
    # to (h, w) = (r // Wp, r % Wp), valid for w < W; rows >= span are junk but
    # always land on w >= W columns of the last row, which get sliced away).
    rows_needed = H * Wp
    if span_p >= rows_needed:
        out = out[:, :rows_needed]
    else:
        out = jnp.pad(out, ((0, 0), (0, rows_needed - span_p), (0, 0)))
    out = out.reshape(N, H, Wp, cout_p)[:, :, :W, :cout]
    return jnp.transpose(out, (0, 3, 1, 2))  # NHWC -> NCHW


# ------------------------------ reference ------------------------------------

def _reference(x_nchw, params, stride=1):
    """Pure-JAX f32 reference using lax.conv_general_dilated (PyTorch layout)."""
    def bn(y, p):
        s, b = _fold_bn(**p)
        return y * s[None, :, None, None] + b[None, :, None, None]

    w1 = jnp.transpose(params["w1"], (1, 0))[:, :, None, None]   # (Cout,Cin,1,1)
    w2 = jnp.transpose(params["w2"], (3, 2, 0, 1))                # (Cout,Cin,3,3)
    w3 = jnp.transpose(params["w3"], (1, 0))[:, :, None, None]

    dn = ("NCHW", "OIHW", "NCHW")
    out = jax.lax.conv_general_dilated(x_nchw, w1, (1, 1), "VALID",
                                       dimension_numbers=dn)
    out = jax.nn.relu(bn(out, params["bn1"]))
    out = jax.lax.conv_general_dilated(out, w2, (stride, stride),
                                       ((1, 1), (1, 1)), dimension_numbers=dn)
    out = jax.nn.relu(bn(out, params["bn2"]))
    out = jax.lax.conv_general_dilated(out, w3, (1, 1), "VALID",
                                       dimension_numbers=dn)
    out = bn(out, params["bn3"]) + x_nchw
    return jax.nn.relu(out)


# --------------------------------- main ---------------------------------------

def _make_params(key, inplanes, planes):
    ks = jax.random.split(key, 12)
    exp = 4

    def bn_params(kg, kb, km, kv, c):
        return dict(
            gamma=jax.random.normal(kg, (c,), jnp.float32) * 0.1 + 1.0,
            beta=jax.random.normal(kb, (c,), jnp.float32) * 0.1,
            mean=jax.random.normal(km, (c,), jnp.float32) * 0.1,
            var=jax.random.uniform(kv, (c,), jnp.float32, 0.5, 1.5),
        )

    return dict(
        w1=jax.random.normal(ks[0], (inplanes, planes), jnp.float32) * 0.1,
        w2=jax.random.normal(ks[1], (3, 3, planes, planes), jnp.float32) * 0.1,
        w3=jax.random.normal(ks[2], (planes, planes * exp), jnp.float32) * 0.1,
        bn1=bn_params(ks[3], ks[4], ks[5], ks[6], planes),
        bn2=bn_params(ks[7], ks[8], ks[9], ks[10], planes),
        bn3=bn_params(*jax.random.split(ks[11], 4), planes * exp),
    )


if __name__ == "__main__":
    key = jax.random.PRNGKey(0)
    k_x, k_p = jax.random.split(key)

    # Bottleneck(inplanes=16, planes=4, stride=1, downsample=None)
    N, inplanes, H, W = 2, 16, 8, 8
    planes = 4
    x = jax.random.normal(k_x, (N, inplanes, H, W), jnp.float32)
    params = _make_params(k_p, inplanes, planes)

    fwd = jax.jit(functools.partial(bottleneck_forward, stride=1))
    out = fwd(x, params)
    jax.block_until_ready(out)

    ref = _reference(x, params, stride=1)
    assert out.shape == (N, planes * 4, H, W), out.shape
    # bf16 activations/weights (f32 accumulation) vs the f32 reference.
    assert jnp.allclose(out, ref, atol=5e-2, rtol=5e-2), float(
        jnp.max(jnp.abs(out - ref)))

    print("KERNEL_OK")
</pallas_src>

<mosaic_0001>
module attributes {stable_mosaic.version = 11 : i64} {
  func.func @_bottleneck_kernel(%arg0: i32, %arg1: memref<1x104x128xbf16, #tpu.memory_space<vmem>>, %arg2: memref<104x1xf32, #tpu.memory_space<vmem>>, %arg3: memref<128x128xbf16, #tpu.memory_space<vmem>>, %arg4: memref<1x128xf32, #tpu.memory_space<vmem>>, %arg5: memref<9x128x128xbf16, #tpu.memory_space<vmem>>, %arg6: memref<1x128xf32, #tpu.memory_space<vmem>>, %arg7: memref<128x128xbf16, #tpu.memory_space<vmem>>, %arg8: memref<1x128xf32, #tpu.memory_space<vmem>>, %arg9: memref<1x80x128xf32, #tpu.memory_space<vmem>>, %arg10: memref<104x128xbf16, #tpu.memory_space<vmem>>) attributes {dimension_semantics = [#tpu.dimension_semantics<parallel>], iteration_bounds = array<i64: 2>, scalar_prefetch = 0 : i64, scratch_operands = 1 : i64, tpu.core_type = #tpu.core_type<tc>, window_params = [{transform_indices = @transform_0, window_bounds = array<i64: 1, 104, 128>}, {pipeline_mode = #tpu.pipeline_mode<synchronous>, transform_indices = @transform_1, window_bounds = array<i64: 104, 1>}, {pipeline_mode = #tpu.pipeline_mode<synchronous>, transform_indices = @transform_2, window_bounds = array<i64: 128, 128>}, {pipeline_mode = #tpu.pipeline_mode<synchronous>, transform_indices = @transform_3, window_bounds = array<i64: 1, 128>}, {pipeline_mode = #tpu.pipeline_mode<synchronous>, transform_indices = @transform_4, window_bounds = array<i64: 9, 128, 128>}, {pipeline_mode = #tpu.pipeline_mode<synchronous>, transform_indices = @transform_5, window_bounds = array<i64: 1, 128>}, {pipeline_mode = #tpu.pipeline_mode<synchronous>, transform_indices = @transform_6, window_bounds = array<i64: 128, 128>}, {pipeline_mode = #tpu.pipeline_mode<synchronous>, transform_indices = @transform_7, window_bounds = array<i64: 1, 128>}, {transform_indices = @transform_8, window_bounds = array<i64: 1, 80, 128>}]} {
    %c0 = arith.constant 0 : index
    %c0_0 = arith.constant 0 : index
    %c0_1 = arith.constant 0 : index
    %0 = vector.load %arg1[%c0, %c0_0, %c0_1] : memref<1x104x128xbf16, #tpu.memory_space<vmem>>, vector<1x104x128xbf16>
    %1 = vector.shape_cast %0 : vector<1x104x128xbf16> to vector<104x128xbf16>
    %c0_2 = arith.constant 0 : index
    %c0_3 = arith.constant 0 : index
    %2 = vector.load %arg3[%c0_2, %c0_3] : memref<128x128xbf16, #tpu.memory_space<vmem>>, vector<128x128xbf16>
    %cst = arith.constant dense<0.000000e+00> : vector<104x128xf32>
    %3 = tpu.matmul %1, %2, %cst {dimension_numbers = #tpu.dot_dimension_numbers<[1], [0], [0], [1], [0, 0, 1, 1], [], []>} : vector<104x128xbf16>, vector<128x128xbf16>, vector<104x128xf32> -> vector<104x128xf32>
    %c0_4 = arith.constant 0 : index
    %c0_5 = arith.constant 0 : index
    %4 = vector.load %arg4[%c0_4, %c0_5] : memref<1x128xf32, #tpu.memory_space<vmem>>, vector<1x128xf32>
    %5 = vector.broadcast %4 : vector<1x128xf32> to vector<104x128xf32>
    %6 = arith.addf %3, %5 : vector<104x128xf32>
    %cst_6 = arith.constant 0.000000e+00 : f32
    %7 = vector.broadcast %cst_6 : f32 to vector<104x128xf32>
    %8 = arith.maximumf %6, %7 : vector<104x128xf32>
    %c0_7 = arith.constant 0 : index
    %c0_8 = arith.constant 0 : index
    %9 = vector.load %arg2[%c0_7, %c0_8] : memref<104x1xf32, #tpu.memory_space<vmem>>, vector<104x1xf32>
    %10 = vector.broadcast %9 : vector<104x1xf32> to vector<104x128xf32>
    %11 = arith.mulf %8, %10 : vector<104x128xf32>
    %12 = arith.truncf %11 : vector<104x128xf32> to vector<104x128xbf16>
    %c0_9 = arith.constant 0 : index
    %c0_10 = arith.constant 0 : index
    %13 = vector.load %arg10[%c0_9, %c0_10] : memref<104x128xbf16, #tpu.memory_space<vmem>>, vector<104x128xbf16>
    tpu.vector_store %arg10[%c0_9, %c0_10], %12 {strides = array<i32>} : memref<104x128xbf16, #tpu.memory_space<vmem>>, vector<104x128xbf16>,
    %cst_11 = arith.constant 0.000000e+00 : f32
    %14 = vector.broadcast %cst_11 : f32 to vector<80x128xf32>
    %c0_12 = arith.constant 0 : index
    %c0_13 = arith.constant 0 : index
    %15 = vector.load %arg10[%c0_12, %c0_13] : memref<104x128xbf16, #tpu.memory_space<vmem>>, vector<80x128xbf16>
    %c0_14 = arith.constant 0 : index
    %c0_15 = arith.constant 0 : index
    %c0_16 = arith.constant 0 : index
    %16 = vector.load %arg5[%c0_14, %c0_15, %c0_16] : memref<9x128x128xbf16, #tpu.memory_space<vmem>>, vector<1x128x128xbf16>
    %17 = vector.shape_cast %16 : vector<1x128x128xbf16> to vector<128x128xbf16>
    %cst_17 = arith.constant dense<0.000000e+00> : vector<80x128xf32>
    %18 = tpu.matmul %15, %17, %cst_17 {dimension_numbers = #tpu.dot_dimension_numbers<[1], [0], [0], [1], [0, 0, 1, 1], [], []>} : vector<80x128xbf16>, vector<128x128xbf16>, vector<80x128xf32> -> vector<80x128xf32>
    %19 = arith.addf %14, %18 : vector<80x128xf32>
    %c1 = arith.constant 1 : index
    %c0_18 = arith.constant 0 : index
    %20 = vector.load %arg10[%c1, %c0_18] : memref<104x128xbf16, #tpu.memory_space<vmem>>, vector<80x128xbf16>
    %c1_19 = arith.constant 1 : index
    %c0_20 = arith.constant 0 : index
    %c0_21 = arith.constant 0 : index
    %21 = vector.load %arg5[%c1_19, %c0_20, %c0_21] : memref<9x128x128xbf16, #tpu.memory_space<vmem>>, vector<1x128x128xbf16>
    %22 = vector.shape_cast %21 : vector<1x128x128xbf16> to vector<128x128xbf16>
    %cst_22 = arith.constant dense<0.000000e+00> : vector<80x128xf32>
    %23 = tpu.matmul %20, %22, %cst_22 {dimension_numbers = #tpu.dot_dimension_numbers<[1], [0], [0], [1], [0, 0, 1, 1], [], []>} : vector<80x128xbf16>, vector<128x128xbf16>, vector<80x128xf32> -> vector<80x128xf32>
    %24 = arith.addf %19, %23 : vector<80x128xf32>
    %c2 = arith.constant 2 : index
    %c0_23 = arith.constant 0 : index
    %25 = vector.load %arg10[%c2, %c0_23] : memref<104x128xbf16, #tpu.memory_space<vmem>>, vector<80x128xbf16>
    %c2_24 = arith.constant 2 : index
    %c0_25 = arith.constant 0 : index
    %c0_26 = arith.constant 0 : index
    %26 = vector.load %arg5[%c2_24, %c0_25, %c0_26] : memref<9x128x128xbf16, #tpu.memory_space<vmem>>, vector<1x128x128xbf16>
    %27 = vector.shape_cast %26 : vector<1x128x128xbf16> to vector<128x128xbf16>
    %cst_27 = arith.constant dense<0.000000e+00> : vector<80x128xf32>
    %28 = tpu.matmul %25, %27, %cst_27 {dimension_numbers = #tpu.dot_dimension_numbers<[1], [0], [0], [1], [0, 0, 1, 1], [], []>} : vector<80x128xbf16>, vector<128x128xbf16>, vector<80x128xf32> -> vector<80x128xf32>
    %29 = arith.addf %24, %28 : vector<80x128xf32>
    %c10 = arith.constant 10 : index
    %c0_28 = arith.constant 0 : index
    %30 = vector.load %arg10[%c10, %c0_28] : memref<104x128xbf16, #tpu.memory_space<vmem>>, vector<80x128xbf16>
    %c3 = arith.constant 3 : index
    %c0_29 = arith.constant 0 : index
    %c0_30 = arith.constant 0 : index
    %31 = vector.load %arg5[%c3, %c0_29, %c0_30] : memref<9x128x128xbf16, #tpu.memory_space<vmem>>, vector<1x128x128xbf16>
    %32 = vector.shape_cast %31 : vector<1x128x128xbf16> to vector<128x128xbf16>
    %cst_31 = arith.constant dense<0.000000e+00> : vector<80x128xf32>
    %33 = tpu.matmul %30, %32, %cst_31 {dimension_numbers = #tpu.dot_dimension_numbers<[1], [0], [0], [1], [0, 0, 1, 1], [], []>} : vector<80x128xbf16>, vector<128x128xbf16>, vector<80x128xf32> -> vector<80x128xf32>
    %34 = arith.addf %29, %33 : vector<80x128xf32>
    %c11 = arith.constant 11 : index
    %c0_32 = arith.constant 0 : index
    %35 = vector.load %arg10[%c11, %c0_32] : memref<104x128xbf16, #tpu.memory_space<vmem>>, vector<80x128xbf16>
    %c4 = arith.constant 4 : index
    %c0_33 = arith.constant 0 : index
    %c0_34 = arith.constant 0 : index
    %36 = vector.load %arg5[%c4, %c0_33, %c0_34] : memref<9x128x128xbf16, #tpu.memory_space<vmem>>, vector<1x128x128xbf16>
    %37 = vector.shape_cast %36 : vector<1x128x128xbf16> to vector<128x128xbf16>
    %cst_35 = arith.constant dense<0.000000e+00> : vector<80x128xf32>
    %38 = tpu.matmul %35, %37, %cst_35 {dimension_numbers = #tpu.dot_dimension_numbers<[1], [0], [0], [1], [0, 0, 1, 1], [], []>} : vector<80x128xbf16>, vector<128x128xbf16>, vector<80x128xf32> -> vector<80x128xf32>
    %39 = arith.addf %34, %38 : vector<80x128xf32>
    %c12 = arith.constant 12 : index
    %c0_36 = arith.constant 0 : index
    %40 = vector.load %arg10[%c12, %c0_36] : memref<104x128xbf16, #tpu.memory_space<vmem>>, vector<80x128xbf16>
    %c5 = arith.constant 5 : index
    %c0_37 = arith.constant 0 : index
    %c0_38 = arith.constant 0 : index
    %41 = vector.load %arg5[%c5, %c0_37, %c0_38] : memref<9x128x128xbf16, #tpu.memory_space<vmem>>, vector<1x128x128xbf16>
    %42 = vector.shape_cast %41 : vector<1x128x128xbf16> to vector<128x128xbf16>
    %cst_39 = arith.constant dense<0.000000e+00> : vector<80x128xf32>
    %43 = tpu.matmul %40, %42, %cst_39 {dimension_numbers = #tpu.dot_dimension_numbers<[1], [0], [0], [1], [0, 0, 1, 1], [], []>} : vector<80x128xbf16>, vector<128x128xbf16>, vector<80x128xf32> -> vector<80x128xf32>
    %44 = arith.addf %39, %43 : vector<80x128xf32>
    %c20 = arith.constant 20 : index
    %c0_40 = arith.constant 0 : index
    %45 = vector.load %arg10[%c20, %c0_40] : memref<104x128xbf16, #tpu.memory_space<vmem>>, vector<80x128xbf16>
    %c6 = arith.constant 6 : index
    %c0_41 = arith.constant 0 : index
    %c0_42 = arith.constant 0 : index
    %46 = vector.load %arg5[%c6, %c0_41, %c0_42] : memref<9x128x128xbf16, #tpu.memory_space<vmem>>, vector<1x128x128xbf16>
    %47 = vector.shape_cast %46 : vector<1x128x128xbf16> to vector<128x128xbf16>
    %cst_43 = arith.constant dense<0.000000e+00> : vector<80x128xf32>
    %48 = tpu.matmul %45, %47, %cst_43 {dimension_numbers = #tpu.dot_dimension_numbers<[1], [0], [0], [1], [0, 0, 1, 1], [], []>} : vector<80x128xbf16>, vector<128x128xbf16>, vector<80x128xf32> -> vector<80x128xf32>
    %49 = arith.addf %44, %48 : vector<80x128xf32>
    %c21 = arith.constant 21 : index
    %c0_44 = arith.constant 0 : index
    %50 = vector.load %arg10[%c21, %c0_44] : memref<104x128xbf16, #tpu.memory_space<vmem>>, vector<80x128xbf16>
    %c7 = arith.constant 7 : index
    %c0_45 = arith.constant 0 : index
    %c0_46 = arith.constant 0 : index
    %51 = vector.load %arg5[%c7, %c0_45, %c0_46] : memref<9x128x128xbf16, #tpu.memory_space<vmem>>, vector<1x128x128xbf16>
    %52 = vector.shape_cast %51 : vector<1x128x128xbf16> to vector<128x128xbf16>
    %cst_47 = arith.constant dense<0.000000e+00> : vector<80x128xf32>
    %53 = tpu.matmul %50, %52, %cst_47 {dimension_numbers = #tpu.dot_dimension_numbers<[1], [0], [0], [1], [0, 0, 1, 1], [], []>} : vector<80x128xbf16>, vector<128x128xbf16>, vector<80x128xf32> -> vector<80x128xf32>
    %54 = arith.addf %49, %53 : vector<80x128xf32>
    %c22 = arith.constant 22 : index
    %c0_48 = arith.constant 0 : index
    %55 = vector.load %arg10[%c22, %c0_48] : memref<104x128xbf16, #tpu.memory_space<vmem>>, vector<80x128xbf16>
    %c8 = arith.constant 8 : index
    %c0_49 = arith.constant 0 : index
    %c0_50 = arith.constant 0 : index
    %56 = vector.load %arg5[%c8, %c0_49, %c0_50] : memref<9x128x128xbf16, #tpu.memory_space<vmem>>, vector<1x128x128xbf16>
    %57 = vector.shape_cast %56 : vector<1x128x128xbf16> to vector<128x128xbf16>
    %cst_51 = arith.constant dense<0.000000e+00> : vector<80x128xf32>
    %58 = tpu.matmul %55, %57, %cst_51 {dimension_numbers = #tpu.dot_dimension_numbers<[1], [0], [0], [1], [0, 0, 1, 1], [], []>} : vector<80x128xbf16>, vector<128x128xbf16>, vector<80x128xf32> -> vector<80x128xf32>
    %59 = arith.addf %54, %58 : vector<80x128xf32>
    %c0_52 = arith.constant 0 : index
    %c0_53 = arith.constant 0 : index
    %60 = vector.load %arg6[%c0_52, %c0_53] : memref<1x128xf32, #tpu.memory_space<vmem>>, vector<1x128xf32>
    %61 = vector.broadcast %60 : vector<1x128xf32> to vector<80x128xf32>
    %62 = arith.addf %59, %61 : vector<80x128xf32>
    %cst_54 = arith.constant 0.000000e+00 : f32
    %63 = vector.broadcast %cst_54 : f32 to vector<80x128xf32>
    %64 = arith.maximumf %62, %63 : vector<80x128xf32>
    %65 = arith.truncf %64 : vector<80x128xf32> to vector<80x128xbf16>
    %c0_55 = arith.constant 0 : index
    %c0_56 = arith.constant 0 : index
    %66 = vector.load %arg7[%c0_55, %c0_56] : memref<128x128xbf16, #tpu.memory_space<vmem>>, vector<128x128xbf16>
    %cst_57 = arith.constant dense<0.000000e+00> : vector<80x128xf32>
    %67 = tpu.matmul %65, %66, %cst_57 {dimension_numbers = #tpu.dot_dimension_numbers<[1], [0], [0], [1], [0, 0, 1, 1], [], []>} : vector<80x128xbf16>, vector<128x128xbf16>, vector<80x128xf32> -> vector<80x128xf32>
    %c0_58 = arith.constant 0 : index
    %c11_59 = arith.constant 11 : index
    %c0_60 = arith.constant 0 : index
    %68 = vector.load %arg1[%c0_58, %c11_59, %c0_60] : memref<1x104x128xbf16, #tpu.memory_space<vmem>>, vector<1x80x128xbf16>
    %69 = vector.shape_cast %68 : vector<1x80x128xbf16> to vector<80x128xbf16>
    %70 = arith.extf %69 : vector<80x128xbf16> to vector<80x128xf32>
    %c0_61 = arith.constant 0 : index
    %c0_62 = arith.constant 0 : index
    %71 = vector.load %arg8[%c0_61, %c0_62] : memref<1x128xf32, #tpu.memory_space<vmem>>, vector<1x128xf32>
    %72 = vector.broadcast %71 : vector<1x128xf32> to vector<80x128xf32>
    %73 = arith.addf %67, %72 : vector<80x128xf32>
    %74 = arith.addf %73, %70 : vector<80x128xf32>
    %cst_63 = arith.constant 0.000000e+00 : f32
    %75 = vector.broadcast %cst_63 : f32 to vector<80x128xf32>
    %76 = arith.maximumf %74, %75 : vector<80x128xf32>
    %c0_64 = arith.constant 0 : index
    %c0_65 = arith.constant 0 : index
    %c0_66 = arith.constant 0 : index
    %77 = vector.load %arg9[%c0_64, %c0_65, %c0_66] : memref<1x80x128xf32, #tpu.memory_space<vmem>>, vector<1x80x128xf32>
    %78 = vector.shape_cast %77 : vector<1x80x128xf32> to vector<80x128xf32>
    %79 = vector.shape_cast %76 : vector<80x128xf32> to vector<1x80x128xf32>
    tpu.vector_store %arg9[%c0_64, %c0_65, %c0_66], %79 {strides = array<i32>} : memref<1x80x128xf32, #tpu.memory_space<vmem>>, vector<1x80x128xf32>,
    return
  }
  func.func @transform_0(%arg0: i32) -> (i32, i32, i32) {
    %c0_i32 = arith.constant 0 : i32
    %c0_i32_0 = arith.constant 0 : i32
    %c0_i32_1 = arith.constant 0 : i32
    return %arg0, %c0_i32, %c0_i32_0 : i32, i32, i32
  }
  func.func @transform_1(%arg0: i32) -> (i32, i32) {
    %c0_i32 = arith.constant 0 : i32
    %c0_i32_0 = arith.constant 0 : i32
    %c0_i32_1 = arith.constant 0 : i32
    return %c0_i32, %c0_i32_0 : i32, i32
  }
  func.func @transform_2(%arg0: i32) -> (i32, i32) {
    %c0_i32 = arith.constant 0 : i32
    %c0_i32_0 = arith.constant 0 : i32
    %c0_i32_1 = arith.constant 0 : i32
    return %c0_i32, %c0_i32_0 : i32, i32
  }
  func.func @transform_3(%arg0: i32) -> (i32, i32) {
    %c0_i32 = arith.constant 0 : i32
    %c0_i32_0 = arith.constant 0 : i32
    %c0_i32_1 = arith.constant 0 : i32
    return %c0_i32, %c0_i32_0 : i32, i32
  }
  func.func @transform_4(%arg0: i32) -> (i32, i32, i32) {
    %c0_i32 = arith.constant 0 : i32
    %c0_i32_0 = arith.constant 0 : i32
    %c0_i32_1 = arith.constant 0 : i32
    %c0_i32_2 = arith.constant 0 : i32
    return %c0_i32, %c0_i32_0, %c0_i32_1 : i32, i32, i32
  }
  func.func @transform_5(%arg0: i32) -> (i32, i32) {
    %c0_i32 = arith.constant 0 : i32
    %c0_i32_0 = arith.constant 0 : i32
    %c0_i32_1 = arith.constant 0 : i32
    return %c0_i32, %c0_i32_0 : i32, i32
  }
  func.func @transform_6(%arg0: i32) -> (i32, i32) {
    %c0_i32 = arith.constant 0 : i32
    %c0_i32_0 = arith.constant 0 : i32
    %c0_i32_1 = arith.constant 0 : i32
    return %c0_i32, %c0_i32_0 : i32, i32
  }
  func.func @transform_7(%arg0: i32) -> (i32, i32) {
    %c0_i32 = arith.constant 0 : i32
    %c0_i32_0 = arith.constant 0 : i32
    %c0_i32_1 = arith.constant 0 : i32
    return %c0_i32, %c0_i32_0 : i32, i32
  }
  func.func @transform_8(%arg0: i32) -> (i32, i32, i32) {
    %c0_i32 = arith.constant 0 : i32
    %c0_i32_0 = arith.constant 0 : i32
    %c0_i32_1 = arith.constant 0 : i32
    return %arg0, %c0_i32, %c0_i32_0 : i32, i32, i32
  }
}

</mosaic_0001>

<bundles_post_ra>
// kernel: bottleneck_forward.1
= control target key start
LH: loop header
LB: loop body
LE: loop exit
PB: predicated region body
PF: predicated region fallthrough
CT: control target
= control target key end

     0   :  { %s3034_s27 = smov 0   ;;  %s3692_s0 = inlined_call_operand.vmem [shape: bf16[2,104,128], index: 0, kind: input, shape index: {}]   ;;  %s3693_s1 = inlined_call_operand.vmem [shape: f32[104,1], index: 1, kind: input, shape index: {}]   ;;  %s3694_s2 = inlined_call_operand.vmem [shape: bf16[128,128], index: 2, kind: input, shape index: {}]   ;;  %s3695_s3 = inlined_call_operand.vmem [shape: f32[1,128], index: 3, kind: input, shape index: {}]   ;;  %s3696_s4 = inlined_call_operand.vmem [shape: bf16[9,128,128], index: 4, kind: input, shape index: {}]   ;;  %s3697_s5 = inlined_call_operand.vmem [shape: f32[1,128], index: 5, kind: input, shape index: {}]   ;;  %s3698_s6 = inlined_call_operand.vmem [shape: bf16[128,128], index: 6, kind: input, shape index: {}]   ;;  %s3699_s7 = inlined_call_operand.vmem [shape: f32[1,128], index: 7, kind: input, shape index: {}]   ;;  %s3700_s8 = inlined_call_operand.vmem [shape: f32[2,80,128], index: 8, kind: output, shape index: {}]  }
   0x1 LB: > { %s2234_s28 = sadd.s32 4294967295, %s2986_s27   ;;  %p2238_p0 = scmp.ge.s32.totalorder %s2986_s27, 1  ;;  %s2986_s27 = sphi %s3034_s27, %s18_s27  }
   0x2   : > { %p262_p1 = scmp.lt.s32.totalorder %s2986_s27, 3 }
   0x4   : > { %p263_p2 = pnand %p2238_p0, %p262_p1 }
   0x5   : > { %p296_p3 = scmp.lt.s32.totalorder (!%p263_p2), %s2234_s28, 1 }
   0x6   : > { %266 = sbr.rel (%p263_p2) target bundleno = 735 (0x2df), region = 52 }
   0xb   : > { %v2808_v0 = vld [vmem:[%s3694_s2 + $0x38] sm:$0xff]  ;;  %v2988_v1 = vmov 0   ;;  %v2807_v2 = vld [vmem:[%s3694_s2 + $0x30] sm:$0xff]  ;;  %v483_v3 = vld [vmem:[%s3693_s1] sm:$0xff]  ;;  %s3702_s28 = smov (!%p296_p3, %s2234_s28), 1  ;;  %vm912_vm0 = vcmask 1046528  }
   0xc   : > { %2974 = vset.pattern.permute.xlu0 %v2988_v1  ;;  %2975 = vset.pattern.permute.xlu1 %v2988_v1  ;;  %v485_v4 = vld [vmem:[%s3693_s1 + $0x10] sm:$0xff]  ;;  %v2806_v5 = vld [vmem:[%s3694_s2 + $0x28] sm:$0xff]  ;;  %v2805_v7 = vld [vmem:[%s3694_s2 + $0x20] sm:$0xff]  ;;  %s2963_s11 = smul.u32 52, %s3702_s28  ;;  %vm672_vm1 = vsmask.f32 7424 }
   0xd   : > { %427 = vmatpush.bf16.msra.mxu0 %v2808_v0  ;;  %2976 = vset.pattern.permute.xlu2 %v2988_v1  ;;  %v484_v6 = vld [vmem:[%s3693_s1 + $0x8] sm:$0xff]  ;;  %v2804_v8 = vld [vmem:[%s3694_s2 + $0x18] sm:$0xff]  ;;  %v489_v10 = vld [vmem:[%s3693_s1 + $0x30] sm:$0xff]  ;;  %vm1378_vm2 = vcmask 1045504   ;;  %vm1844_vm3 = vcmask 1044480   ;;  %s2964_s30 = smul.u32 80, %s3702_s28 }
   0xe   : > { %498 = vperm.xlu0 %2974, %v483_v3   ;;  %508 = vperm.xlu1 %2975, %v485_v4   ;;  %v486_v9 = vld [vmem:[%s3693_s1 + $0x18] sm:$0xff]  ;;  %v2803_v11 = vld [vmem:[%s3694_s2 + $0x10] sm:$0xff]  ;;  %v2802_v12 = vld [vmem:[%s3694_s2 + $0x8] sm:$0xff]  ;;  %s3093_s20 = scalar_lea.vmem %s3692_s0, %s2963_s11  ;;  %vm1672_vm4 = vsmask.f32 5376 }
   0xf   : > { %v490_v13 = vld [vmem:[%s3693_s1 + $0x38] sm:$0xff]  ;;  %v492_v14 = vld [vmem:[%s3693_s1 + $0x48] sm:$0xff]  ;;  %v2801_v15 = vld [vmem:[%s3694_s2] sm:$0xff]  ;;  %vm1206_vm5 = vsmask.f32 6400  ;;  %s3654_s11 = scalar_lea.vmem %s3700_s8, %s2964_s30 }
  0x10   : > { %v2795_v16 = vld [vmem:[%s3093_s20] sm:$0xff]  ;;  %v493_v17 = vld [vmem:[%s3693_s1 + $0x50] sm:$0xff]  ;;  %v2796_v19 = vld [vmem:[%s3093_s20 + $0x8] sm:$0xff] }
  0x11   : > { %428 = vmatpush.bf16.msra.mxu0 %v2807_v2  ;;  %v495_v18 = vld [vmem:[%s3693_s1 + $0x60] sm:$0xff]  ;;  %v488_v21 = vld [vmem:[%s3693_s1 + $0x28] sm:$0xff]  ;;  %v2797_v22 = vld [vmem:[%s3093_s20 + $0x10] sm:$0xff] }
  0x12   : > { %v487_v20 = vld [vmem:[%s3693_s1 + $0x20] sm:$0xff]  ;;  %v494_v24 = vld [vmem:[%s3693_s1 + $0x58] sm:$0xff]  ;;  %v2819_v28 = vld [vmem:[%s3696_s4 + $0x30] sm:$0xff] }
  0x13   : > { %518 = vperm.xlu2 %2976, %v487_v20   ;;  %v491_v23 = vld [vmem:[%s3693_s1 + $0x40] sm:$0xff]  ;;  %v2798_v25 = vld [vmem:[%s3093_s20 + $0x18] sm:$0xff]  ;;  %v2800_v29 = vld [vmem:[%s3093_s20 + $0x28] sm:$0xff] }
  0x14   : > { %v2799_v26 = vld [vmem:[%s3093_s20 + $0x20] sm:$0xff]  ;;  %v2820_v27 = vld [vmem:[%s3696_s4 + $0x38] sm:$0xff]  ;;  %v318_v30 = vld [vmem:[%s3093_s20 + $0x30] sm:$0xf] }
  0x15   : > { %429 = vmatpush.bf16.msra.mxu0 %v2806_v5  ;;  %857 = vmatpush.bf16.msra.mxu2 %v2820_v27  ;;  %v2818_v31 = vld [vmem:[%s3696_s4 + $0x28] sm:$0xff]  ;;  %v364_v32 = vunpack.c.l.b16 %v318_v30  ;;  %v2817_v33 = vld [vmem:[%s3696_s4 + $0x20] sm:$0xff]  ;;  %v2816_v35 = vld [vmem:[%s3696_s4 + $0x18] sm:$0xff] }
  0x16   : > { %503 = vperm.xlu0 %2974, %v484_v6   ;;  %513 = vperm.xlu1 %2975, %v486_v9   ;;  %v2815_v36 = vld [vmem:[%s3696_s4 + $0x10] sm:$0xff]  ;;  %v2814_v37 = vld [vmem:[%s3696_s4 + $0x8] sm:$0xff]  ;;  %v2836_v38 = vld [vmem:[%s3696_s4 + $0xb8] sm:$0xff] }
  0x17   : > { %v371_v34 = vpack.c.b16 %v364_v32, %v364_v32  ;;  %v2813_v39 = vld [vmem:[%s3696_s4] sm:$0xff]  ;;  %977 = vmatpush.bf16.msra.mxu3 %v2836_v38  ;;  %v2828_v40 = vld [vmem:[%s3696_s4 + $0x78] sm:$0xff]  ;;  %v2835_v41 = vld [vmem:[%s3696_s4 + $0xb0] sm:$0xff] }
  0x18   : > { %770 = vmatpush.bf16.msra.mxu1 %v2828_v40  ;;  %v2827_v42 = vld [vmem:[%s3696_s4 + $0x70] sm:$0xff]  ;;  %v2834_v43 = vld [vmem:[%s3696_s4 + $0xa8] sm:$0xff]  ;;  %v2833_v45 = vld [vmem:[%s3696_s4 + $0xa0] sm:$0xff] }
  0x19   : > { %430 = vmatpush.bf16.msra.mxu0 %v2805_v7  ;;  %858 = vmatpush.bf16.msra.mxu2 %v2819_v28  ;;  %v2826_v44 = vld [vmem:[%s3696_s4 + $0x68] sm:$0xff]  ;;  %v2825_v46 = vld [vmem:[%s3696_s4 + $0x60] sm:$0xff]  ;;  %v2832_v47 = vld [vmem:[%s3696_s4 + $0x98] sm:$0xff] }
  0x1a   : > { %v2876_v48 = vld [vmem:[%s3696_s4 + $0x1b8] sm:$0xff]  ;;  %v2831_v51 = vld [vmem:[%s3696_s4 + $0x90] sm:$0xff]  ;;  %v3186_v53 = vld [vmem:[%s3695_s3] ss:$0 sm:$0xff] }
  0x1b   : > { %523 = vperm.xlu2 %2976, %v488_v21   ;;  %978 = vmatpush.bf16.msra.mxu3 %v2835_v41  ;;  %v2824_v49 = vld [vmem:[%s3696_s4 + $0x58] sm:$0xff]  ;;  %v2875_v52 = vld [vmem:[%s3696_s4 + $0x1b0] sm:$0xff]  ;;  %v2830_v56 = vld [vmem:[%s3696_s4 + $0x88] sm:$0xff] }
  0x1c   : > { %771 = vmatpush.bf16.msra.mxu1 %v2827_v42  ;;  %v2823_v55 = vld [vmem:[%s3696_s4 + $0x50] sm:$0xff]  ;;  %v2874_v57 = vld [vmem:[%s3696_s4 + $0x1a8] sm:$0xff]  ;;  %v2829_v61 = vld [vmem:[%s3696_s4 + $0x80] sm:$0xff] }
  0x1d   : > { %431 = vmatpush.bf16.msra.mxu0 %v2804_v8  ;;  %859 = vmatpush.bf16.msra.mxu2 %v2818_v31  ;;  %v2822_v59 = vld [vmem:[%s3696_s4 + $0x48] sm:$0xff]  ;;  %v2873_v62 = vld [vmem:[%s3696_s4 + $0x1a0] sm:$0xff]  ;;  %v2872_v4 = vld [vmem:[%s3696_s4 + $0x198] sm:$0xff] }
  0x1e   : > { %528 = vperm.xlu0 %2974, %v489_v10   ;;  %533 = vperm.xlu1 %2975, %v490_v13   ;;  %v2821_v1 = vld [vmem:[%s3696_s4 + $0x40] sm:$0xff]  ;;  %v2871_v9 = vld [vmem:[%s3696_s4 + $0x190] sm:$0xff]  ;;  %v2856_v10 = vld [vmem:[%s3696_s4 + $0x138] sm:$0xff] }
  0x1f   : > { %979 = vmatpush.bf16.msra.mxu3 %v2834_v43  ;;  %v2854_v32 = vld [vmem:[%s3696_s4 + $0x128] sm:$0xff] }
  0x20   : > { %772 = vmatpush.bf16.msra.mxu1 %v2826_v44 }
  0x21   : > { %432 = vmatpush.bf16.msra.mxu0 %v2803_v11  ;;  %860 = vmatpush.bf16.msra.mxu2 %v2817_v33  ;;  %v2846_v33 = vld [vmem:[%s3696_s4 + $0xe8] sm:$0xff] }
  0x23   : > { %538 = vperm.xlu2 %2976, %v491_v23   ;;  %980 = vmatpush.bf16.msra.mxu3 %v2833_v45 }
  0x24   : > { %773 = vmatpush.bf16.msra.mxu1 %v2825_v46 }
  0x25   : > { %433 = vmatpush.bf16.msra.mxu0 %v2802_v12  ;;  %861 = vmatpush.bf16.msra.mxu2 %v2816_v35  ;;  %v2870_v12 = vld [vmem:[%s3696_s4 + $0x188] sm:$0xff] }
  0x26   : > { %543 = vperm.xlu0 %2974, %v492_v14   ;;  %548 = vperm.xlu1 %2975, %v493_v17   ;;  %v2848_v14 = vld [vmem:[%s3696_s4 + $0xf8] sm:$0xff] }
  0x27   : > { %981 = vmatpush.bf16.msra.mxu3 %v2832_v47 }
  0x28   : > { %774 = vmatpush.bf16.msra.mxu1 %v2824_v49 }
  0x29   : > { %434 = vmatpush.bf16.msra.mxu0 %v2801_v15  ;;  %862 = vmatpush.bf16.msra.mxu2 %v2815_v36 }
  0x2b   : > { %553 = vperm.xlu2 %2976, %v494_v24   ;;  %982 = vmatpush.bf16.msra.mxu3 %v2831_v51 }
  0x2c   : > { %435 = vmatmul.bf16.vlgmr.msra.gmra.mxu0 %v2795_v16  ;;  %775 = vmatpush.bf16.msra.mxu1 %v2823_v55  ;;  %v2869_v16 = vld [vmem:[%s3696_s4 + $0x180] sm:$0xff] }
  0x2d   : > { %863 = vmatpush.bf16.msra.mxu2 %v2814_v37  ;;  %1607 = vmatpush.bf16.msrb.mxu0 %v2876_v48 }
  0x2e   : > { %558 = vperm.xlu0 %2974, %v495_v18  }
  0x2f   : > { %983 = vmatpush.bf16.msra.mxu3 %v2830_v56 }
  0x30   : > { %776 = vmatpush.bf16.msra.mxu1 %v2822_v59  ;;  %v2853_v59 = vld [vmem:[%s3696_s4 + $0x120] sm:$0xff] }
  0x31   : > { %864 = vmatpush.bf16.msra.mxu2 %v2813_v39  ;;  %1608 = vmatpush.bf16.msrb.mxu0 %v2875_v52 }
  0x33   : > { %984 = vmatpush.bf16.msra.mxu3 %v2829_v61 }
  0x34   : > { %777 = vmatpush.bf16.msra.mxu1 %v2821_v1 }
  0x35   : > { %1609 = vmatpush.bf16.msrb.mxu0 %v2874_v57  ;;  %1313 = vmatpush.bf16.msrb.mxu2 %v2856_v10 }
  0x38   : > { %1141 = vmatpush.bf16.msrb.mxu1 %v2848_v14 }
  0x39   : > { %1610 = vmatpush.bf16.msrb.mxu0 %v2873_v62 }
  0x3c   : > { %440 = vmatmul.bf16.gmra.mxu0 %v2796_v19 }
  0x3d   : > { %1611 = vmatpush.bf16.msrb.mxu0 %v2872_v4 }
  0x41   : > { %1612 = vmatpush.bf16.msrb.mxu0 %v2871_v9 }
  0x45   : > { %1613 = vmatpush.bf16.msrb.mxu0 %v2870_v12 }
  0x49   : > { %1614 = vmatpush.bf16.msrb.mxu0 %v2869_v16 }
  0x4c   : > { %445 = vmatmul.bf16.gmra.mxu0 %v2797_v22 }
  0x5c   : > { %450 = vmatmul.bf16.gmra.mxu0 %v2798_v25  ;;  %v2855_v25 = vld [vmem:[%s3696_s4 + $0x130] sm:$0xff] }
  0x5d   : > { %1314 = vmatpush.bf16.msrb.mxu2 %v2855_v25 }
  0x61   : > { %1315 = vmatpush.bf16.msrb.mxu2 %v2854_v32 }
  0x65   : > { %1316 = vmatpush.bf16.msrb.mxu2 %v2853_v59  ;;  %v2861_v59 = vld [vmem:[%s3696_s4 + $0x160] sm:$0xff] }
  0x6c   : > { %455 = vmatmul.bf16.gmra.mxu0 %v2799_v26  ;;  %v2847_v26 = vld [vmem:[%s3696_s4 + $0xf0] sm:$0xff] }
  0x6d   : > { %v519_v27 = vpop.permute.xlu2 %518  ;;  %1142 = vmatpush.bf16.msrb.mxu1 %v2847_v26 }
  0x71   : > { %1143 = vmatpush.bf16.msrb.mxu1 %v2846_v33 }
  0x75   : > { %v524_v45 = vpop.permute.xlu2 %523 }
  0x7c   : > { %460 = vmatmul.bf16.gmra.mxu0 %v2800_v29 }
  0x80   : > { %v499_v54 = vpop.permute.xlu0 %498  ;;  %v509_v11 = vpop.permute.xlu1 %508 }
  0x88   : > { %v504_v3 = vpop.permute.xlu0 %503  ;;  %v514_v20 = vpop.permute.xlu1 %513 }
  0x8c   : > { %465 = vmatmul.bf16.gmra.mxu0 %v371_v34 }
  0x90   : > { %v529_v16 = vpop.permute.xlu0 %528 }
  0xa9   : > { %v436_v50 = vpop.f32.mrf.mxu0 }
  0xaa   : > { %v437_v58 = vadd.f32 %v3186_v53, %v436_v50 }
  0xac   : > { %v470_v63 = vmax.f32 %v437_v58, 0.0 }
  0xae   : > { %v561_v5 = vmul.f32 %v499_v54, %v470_v63  ;;  %v2845_v63 = vld [vmem:[%s3696_s4 + $0xe0] sm:$0xff] }
  0xaf   : > { %1144 = vmatpush.bf16.msrb.mxu1 %v2845_v63 }
  0xb1   : > { %v438_v60 = vpop.f32.mrf.mxu0 }
  0xb2   : > { %v439_v0 = vadd.f32 %v3186_v53, %v438_v60 }
  0xb4   : > { %v471_v2 = vmax.f32 %v439_v0, 0.0  ;;  %v2852_v0 = vld [vmem:[%s3696_s4 + $0x118] sm:$0xff] }
  0xb5   : > { %1317 = vmatpush.bf16.msrb.mxu2 %v2852_v0 }
  0xb6   : > { %v562_v6 = vmul.f32 %v504_v3, %v471_v2 }
  0xb8   : > { %v2904_v7 = vpack.c.bf16 %v562_v6, %v561_v5 }
  0xb9   : > { %v441_v8 = vpop.f32.mrf.mxu0 }
  0xba   : > { %2905 = vst [vmem:[#allocation2] sm:$0xff] %v2904_v7   ;;  %865 = vmatmul.bf16.vlgmr.msra.gmra.mxu2 %v2904_v7  ;;  %v442_v13 = vadd.f32 %v3186_v53, %v441_v8  ;;  %v676_v30 = vshll.u32 %v2904_v7, 16  ;;  %v674_v40 = vshrl.u32 %v2904_v7, 16 }
  0xbc   : > { %v472_v17 = vmax.f32 %v442_v13, 0.0  ;;  %v678_v35 = vrot.slane %v676_v30, 1  ;;  %v2864_v30 = vld [vmem:[%s3696_s4 + $0x178] sm:$0xff] }
  0xbd   : > { %1443 = vmatpush.bf16.msrb.mxu3 %v2864_v30 }
  0xbe   : > { %v563_v21 = vmul.f32 %v509_v11, %v472_v17  ;;  %v679_v47 = vor.u32 %v678_v35, %v674_v40  ;;  %v534_v17 = vpop.permute.xlu1 %533  ;;  %v2863_v40 = vld [vmem:[%s3696_s4 + $0x170] sm:$0xff] }
  0xc1   : > { %v443_v15 = vpop.f32.mrf.mxu0  ;;  %v2956_v28 = vld [vmem:[#allocation2] sm:$0xf0]  ;;  %v2957_v29 = vld [vmem:[#allocation2] sm:$0xe]  ;;  %1444 = vmatpush.bf16.msrb.mxu3 %v2863_v40 }
  0xc2   : > { %v444_v18 = vadd.f32 %v3186_v53, %v443_v15  ;;  %v2958_v34 = vor.u32 %v2957_v29, %v2956_v28 }
  0xc4   : > { %v473_v19 = vmax.f32 %v444_v18, 0.0  ;;  %v913_v41 = vrot.slane %v2958_v34, 1 }
  0xc6   : > { %v564_v22 = vmul.f32 %v514_v20, %v473_v19  ;;  %v549_v40 = vpop.permute.xlu1 %548 }
  0xc8   : > { %v2909_v23 = vpack.c.bf16 %v564_v22, %v563_v21 }
  0xc9   : > { %v446_v24 = vpop.f32.mrf.mxu0 }
  0xca   : > { %2951 = vst [vmem:[#allocation2 + $0x8] sm:$0xff] %v2909_v23   ;;  %v447_v31 = vadd.f32 %v3186_v53, %v446_v24  ;;  %v2851_v24 = vld [vmem:[%s3696_s4 + $0x110] sm:$0xff] }
  0xcb   : > { %1318 = vmatpush.bf16.msrb.mxu2 %v2851_v24 }
  0xcc   : > { %v474_v38 = vmax.f32 %v447_v31, 0.0 }
  0xce   : > { %v565_v49 = vmul.f32 %v519_v27, %v474_v38 }
  0xd1   : > { %v448_v36 = vpop.f32.mrf.mxu0  ;;  %v2809_v37 = vld [vmem:[#allocation2 + $0x8] sm:$0xff] }
  0xd2   : > { %v449_v39 = vadd.f32 %v3186_v53, %v448_v36  ;;  %870 = vmatmul.bf16.gmra.mxu2 %v2809_v37  ;;  %v914_v42 = vrot.slane %v2809_v37, 1  ;;  %v681_v43 = vshll.u32 %v2809_v37, 16  ;;  %v1487_v52 = vld [vmem:[#allocation2 + $0x8] sm:$0xc]  ;;  %v685_v5 = vshrl.u32 %v2809_v37, 16  ;;  %v2844_v36 = vld [vmem:[%s3696_s4 + $0xd8] sm:$0xff] }
  0xd3   : > { %v3247_v54 = vld [vmem:[#allocation2 + $0x8] sm:$0xff]   ;;  %v1526_v57 = vunpack.c.l.b16 %v1487_v52  ;;  %1145 = vmatpush.bf16.msrb.mxu1 %v2844_v36  ;;  %v2843_v52 = vld [vmem:[%s3696_s4 + $0xd0] sm:$0xff] }
  0xd4   : > { %v475_v44 = vmax.f32 %v449_v39, 0.0  ;;  %v915_v46 = vsel %vm912_vm0, %v913_v41, %v914_v42  ;;  %v683_v48 = vrot.slane %v681_v43, 1  ;;  %v1527_v58 = vunpack.c.h.b16 %v3247_v54  ;;  %v1823_v60 = vld [vmem:[#allocation2 + $0x8] sm:$0x8] }
  0xd5   : > { %985 = vmatmul.bf16.vlgmr.msra.gmra.mxu3 %v915_v46  ;;  %v1842_v1 = vunpack.c.l.b16 %v1823_v60  ;;  %v2850_v37 = vld [vmem:[%s3696_s4 + $0x108] sm:$0xff] }
  0xd6   : > { %v566_v50 = vmul.f32 %v524_v45, %v475_v44  ;;  %v684_v51 = vsel %vm672_vm1, %v679_v47, %v683_v48  ;;  %v1537_v62 = vpack.c.b16 %v1527_v58, %v1526_v57  ;;  %v687_v20 = vor.u32 %v685_v5, %v683_v48  ;;  %1319 = vmatpush.bf16.msrb.mxu2 %v2850_v37  ;;  %v2849_v44 = vld [vmem:[%s3696_s4 + $0x100] sm:$0xff]  ;;  %v2862_v46 = vld [vmem:[%s3696_s4 + $0x168] sm:$0xff] }
  0xd7   : > { %778 = vmatmul.bf16.vlgmr.msra.gmra.mxu1 %v684_v51  ;;  %v1843_v9 = vpack.c.b16 %v1527_v58, %v1842_v1  ;;  %1445 = vmatpush.bf16.msrb.mxu3 %v2862_v46  ;;  %v2842_v5 = vld [vmem:[%s3696_s4 + $0xc8] sm:$0xff]  ;;  %v2857_v37 = vld [vmem:[%s3696_s4 + $0x140] sm:$0xff] }
  0xd8   : > { %v2914_v55 = vpack.c.bf16 %v566_v50, %v565_v49  ;;  %v1543_v8 = vrot.slane %v1537_v62, 2  ;;  %v1674_v13 = vshrl.u32 %v1537_v62, 16  ;;  %v1677_v15 = vshll.u32 %v1537_v62, 16  ;;  %1146 = vmatpush.bf16.msrb.mxu1 %v2843_v52  ;;  %v539_v62 = vpop.permute.xlu2 %538 }
  0xd9   : > { %v451_v56 = vpop.f32.mrf.mxu0  ;;  %v1845_v26 = vrot.slane %v1843_v9, 3 }
  0xda   : > { %2952 = vst [vmem:[#allocation2 + $0x10] sm:$0xff] %v2914_v55   ;;  %v452_v61 = vadd.f32 %v3186_v53, %v451_v56  ;;  %v1676_v28 = vrot.slane %v1674_v13, 2  ;;  %v1679_v31 = vrot.slane %v1677_v15, 3  ;;  %1320 = vmatpush.bf16.msrb.mxu2 %v2849_v44  ;;  %v2860_v13 = vld [vmem:[%s3696_s4 + $0x158] sm:$0xff] }
  0xdb   : > { %1446 = vmatpush.bf16.msrb.mxu3 %v2861_v59 }
  0xdc   : > { %v476_v6 = vmax.f32 %v452_v61, 0.0  ;;  %v1680_v41 = vor.u32 %v1679_v31, %v1676_v28  ;;  %v544_v61 = vpop.permute.xlu0 %543  ;;  %1147 = vmatpush.bf16.msrb.mxu1 %v2842_v5 }
  0xde   : > { %v567_v22 = vmul.f32 %v529_v16, %v476_v6 }
  0xdf   : > { %1447 = vmatpush.bf16.msrb.mxu3 %v2860_v13 }
  0xe1   : > { %v453_v2 = vpop.f32.mrf.mxu0  ;;  %v3260_v3 = vld [vmem:[#allocation2 + $0x10] sm:$0xff] }
  0xe2   : > { %v3262_v4 = vld [vmem:[#allocation2 + $0x10] sm:$0xff]  ;;  %v454_v7 = vadd.f32 %v3186_v53, %v453_v2  ;;  %875 = vmatmul.bf16.gmra.mxu2 %v3260_v3  ;;  %v916_v10 = vrot.slane %v3260_v3, 1  ;;  %v689_v12 = vshll.u32 %v3260_v3, 16  ;;  %v693_v57 = vshrl.u32 %v3260_v3, 16 }
  0xe3   : > { %v1544_v11 = vrot.slane %v3262_v4, 2  ;;  %v1846_v27 = vrot.slane %v3262_v4, 3  ;;  %v1682_v32 = vshrl.u32 %v3262_v4, 16  ;;  %v1685_v33 = vshll.u32 %v3262_v4, 16  ;;  %v3369_v24 = vld [vmem:[#allocation2 + $0xc] sm:$0xff] }
  0xe4   : > { %v477_v14 = vmax.f32 %v454_v7, 0.0  ;;  %v917_v18 = vsel %vm912_vm0, %v914_v42, %v916_v10  ;;  %v691_v21 = vrot.slane %v689_v12, 1 }
  0xe5   : > { %v1545_v19 = vsel %vm1378_vm2, %v1543_v8, %v1544_v11  ;;  %990 = vmatmul.bf16.gmra.mxu3 %v917_v18  ;;  %v3288_v35 = vsel %vm1844_vm3, %v1845_v26, %v1846_v27  ;;  %v1684_v38 = vrot.slane %v1682_v32, 2  ;;  %v1687_v39 = vrot.slane %v1685_v33, 3  ;;  %v2841_v18 = vld [vmem:[%s3696_s4 + $0xc0] sm:$0xff] }
  0xe6   : > { %v568_v23 = vmul.f32 %v534_v17, %v477_v14  ;;  %1615 = vmatmul.bf16.vlgmr.msrb.gmra.mxu0 %v1545_v19  ;;  %v692_v25 = vsel %vm672_vm1, %v687_v20, %v691_v21  ;;  %v695_v1 = vor.u32 %v693_v57, %v691_v21  ;;  %v2859_v17 = vld [vmem:[%s3696_s4 + $0x150] sm:$0xff]  ;;  %v1021_v20 = vld [vmem:[#allocation2 + $0x4] sm:$0xe]  ;;  %1148 = vmatpush.bf16.msrb.mxu1 %v2841_v18  ;;  %v1061_v21 = vunpack.c.l.b16 %v3247_v54 }
  0xe7   : > { %783 = vmatmul.bf16.gmra.mxu1 %v692_v25  ;;  %v1688_v42 = vor.u32 %v1687_v39, %v1684_v38  ;;  %1448 = vmatpush.bf16.msrb.mxu3 %v2859_v17  ;;  %v1060_v25 = vunpack.c.l.b16 %v1021_v20  ;;  %v1216_v39 = vshrl.u32 %v3369_v24, 16  ;;  %v1078_v54 = vrot.slane %v3369_v24, 1 }
  0xe8   : > { %v2919_v29 = vpack.c.bf16 %v568_v23, %v567_v22  ;;  %v2858_v23 = vld [vmem:[%s3696_s4 + $0x148] sm:$0xff] }
  0xe9   : > { %v456_v34 = vpop.f32.mrf.mxu0  ;;  %v3304_v45 = vsel %vm1672_vm4, %v1680_v41, %v1688_v42  ;;  %v3378_v31 = vpack.c.b16 %v1061_v21, %v1060_v25  ;;  %v554_v41 = vpop.permute.xlu2 %553 }
  0xea   : > { %2953 = vst [vmem:[#allocation2 + $0x18] sm:$0xff] %v2919_v29   ;;  %v457_v43 = vadd.f32 %v3186_v53, %v456_v34 }
  0xeb   : > { %1449 = vmatpush.bf16.msrb.mxu3 %v2858_v23 }
  0xec   : > { %v478_v50 = vmax.f32 %v457_v43, 0.0 }
  0xee   : > { %v569_v6 = vmul.f32 %v539_v62, %v478_v50  ;;  %v1218_v62 = vrot.slane %v1216_v39, 1 }
  0xef   : > { %1450 = vmatpush.bf16.msrb.mxu3 %v2857_v37 }
  0xf1   : > { %v458_v47 = vpop.f32.mrf.mxu0  ;;  %v3309_v48 = vld [vmem:[#allocation2 + $0x18] sm:$0xff] }
  0xf2   : > { %v3311_v49 = vld [vmem:[#allocation2 + $0x18] sm:$0xff]  ;;  %v459_v51 = vadd.f32 %v3186_v53, %v458_v47  ;;  %880 = vmatmul.bf16.gmra.mxu2 %v3309_v48  ;;  %v918_v55 = vrot.slane %v3309_v48, 1  ;;  %v697_v58 = vshll.u32 %v3309_v48, 16  ;;  %v701_v34 = vshrl.u32 %v3309_v48, 16 }
  0xf3   : > { %v1546_v56 = vrot.slane %v3311_v49, 2  ;;  %v1848_v8 = vrot.slane %v3311_v49, 3  ;;  %v2892_v48 = vld [vmem:[%s3696_s4 + $0x238] sm:$0xff] }
  0xf4   : > { %v479_v60 = vmax.f32 %v459_v51, 0.0  ;;  %v919_v63 = vsel %vm912_vm0, %v916_v10, %v918_v55  ;;  %v699_v2 = vrot.slane %v697_v58, 1  ;;  %v1691_v10 = vshrl.u32 %v3311_v49, 16  ;;  %1909 = vmatpush.bf16.msra.mxu2 %v2892_v48  ;;  %v3427_v18 = vld [vmem:[#allocation2 + $0x14] sm:$0xff] }
  0xf5   : > { %v1547_v0 = vsel %vm1378_vm2, %v1544_v11, %v1546_v56  ;;  %995 = vmatmul.bf16.gmra.mxu3 %v919_v63  ;;  %v1694_v11 = vshll.u32 %v3311_v49, 16  ;;  %v3350_v14 = vsel %vm1844_vm3, %v1846_v27, %v1848_v8  ;;  %v1219_v51 = vshll.u32 %v3369_v24, 16 }
  0xf6   : > { %v570_v7 = vmul.f32 %v544_v61, %v479_v60  ;;  %1620 = vmatmul.bf16.gmra.mxu0 %v1547_v0  ;;  %v700_v3 = vsel %vm672_vm1, %v695_v1, %v699_v2  ;;  %v1693_v15 = vrot.slane %v1691_v10, 2  ;;  %v703_v44 = vor.u32 %v701_v34, %v699_v2 }
  0xf7   : > { %788 = vmatmul.bf16.gmra.mxu1 %v700_v3  ;;  %v1696_v16 = vrot.slane %v1694_v11, 3  ;;  %v1211_v58 = vshll.u32 %v3378_v31, 16  ;;  %v1221_v1 = vrot.slane %v1219_v51, 2 }
  0xf8   : > { %v2924_v9 = vpack.c.bf16 %v570_v7, %v569_v6  ;;  %v2884_v6 = vld [vmem:[%s3696_s4 + $0x1f8] sm:$0xff]  ;;  %v2891_v7 = vld [vmem:[%s3696_s4 + $0x230] sm:$0xff] }
  0xf9   : > { %v461_v12 = vpop.f32.mrf.mxu0  ;;  %v3358_v19 = vor.u32 %v1696_v16, %v1693_v15  ;;  %v1213_v49 = vrot.slane %v1211_v58, 2  ;;  %1779 = vmatpush.bf16.msra.mxu1 %v2884_v6  ;;  %1910 = vmatpush.bf16.msra.mxu2 %v2891_v7 }
  0xfa   : > { %2954 = vst [vmem:[#allocation2 + $0x20] sm:$0xff] %v2924_v9   ;;  %v462_v4 = vadd.f32 %v3186_v53, %v461_v12 }
  0xfb   : > { %v3364_v22 = vsel %vm1672_vm4, %v1688_v42, %v3358_v19 }
  0xfc   : > { %v480_v29 = vmax.f32 %v462_v4, 0.0 }
  0xfe   : > { %v571_v47 = vmul.f32 %v549_v40, %v480_v29 }
 0x101   : > { %v463_v26 = vpop.f32.mrf.mxu0  ;;  %v3371_v27 = vld [vmem:[#allocation2 + $0x20] sm:$0xff] }
 0x102   : > { %v3373_v28 = vld [vmem:[#allocation2 + $0x20] sm:$0xff]  ;;  %v464_v30 = vadd.f32 %v3186_v53, %v463_v26  ;;  %885 = vmatmul.bf16.gmra.mxu2 %v3371_v27  ;;  %v920_v32 = vrot.slane %v3371_v27, 1  ;;  %v705_v36 = vshll.u32 %v3371_v27, 16 }
 0x103   : > { %v1548_v33 = vrot.slane %v3373_v28, 2  ;;  %v1850_v57 = vrot.slane %v3373_v28, 3  ;;  %v1700_v59 = vshrl.u32 %v3373_v28, 16  ;;  %v1703_v60 = vshll.u32 %v3373_v28, 16 }
 0x104   : > { %v481_v38 = vmax.f32 %v464_v30, 0.0  ;;  %v921_v42 = vsel %vm912_vm0, %v918_v55, %v920_v32  ;;  %v707_v46 = vrot.slane %v705_v36, 1  ;;  %v1208_v55 = vshrl.u32 %v3378_v31, 16 }
 0x105   : > { %v1549_v43 = vsel %vm1378_vm2, %v1546_v56, %v1548_v33  ;;  %1000 = vmatmul.bf16.gmra.mxu3 %v921_v42  ;;  %v3412_v63 = vsel %vm1844_vm3, %v1848_v8, %v1850_v57  ;;  %v1702_v2 = vrot.slane %v1700_v59, 2  ;;  %v1705_v5 = vrot.slane %v1703_v60, 3  ;;  %v559_v8 = vpop.permute.xlu0 %558 }
 0x106   : > { %v572_v50 = vmul.f32 %v554_v41, %v481_v38  ;;  %1625 = vmatmul.bf16.gmra.mxu0 %v1549_v43  ;;  %v708_v52 = vsel %vm672_vm1, %v703_v44, %v707_v46  ;;  %v1210_v9 = vrot.slane %v1208_v55, 1  ;;  %v1225_v30 = vshrl.u32 %v3427_v18, 16 }
 0x107   : > { %793 = vmatmul.bf16.gmra.mxu1 %v708_v52  ;;  %v1706_v10 = vor.u32 %v1705_v5, %v1702_v2  ;;  %v709_v36 = vshrl.u32 %v3371_v27, 16  ;;  %v1228_v38 = vshll.u32 %v3427_v18, 16  ;;  %v2890_v27 = vld [vmem:[%s3696_s4 + $0x228] sm:$0xff] }
 0x108   : > { %v2929_v56 = vpack.c.bf16 %v572_v50, %v571_v47  ;;  %v1214_v15 = vor.u32 %v1213_v49, %v1210_v9  ;;  %1911 = vmatpush.bf16.msra.mxu2 %v2890_v27  ;;  %v3468_v49 = vld [vmem:[#allocation2 + $0x1c] sm:$0xff] }
 0x109   : > { %v466_v61 = vpop.f32.mrf.mxu0  ;;  %v3423_v12 = vsel %vm1672_vm4, %v3358_v19, %v1706_v10  ;;  %v2883_v19 = vld [vmem:[%s3696_s4 + $0x1f0] sm:$0xff]  ;;  %v711_v40 = vor.u32 %v709_v36, %v707_v46  ;;  %v1230_v47 = vrot.slane %v1228_v38, 2  ;;  %v1382_v36 = vrot.slane %v3427_v18, 2 }
 0x10a   : > { %2955 = vst [vmem:[#allocation2 + $0x28] sm:$0xff] %v2929_v56   ;;  %v467_v0 = vadd.f32 %v3186_v53, %v466_v61  ;;  %v1222_v53 = vor.u32 %v1221_v1, %v1218_v62  ;;  %1780 = vmatpush.bf16.msra.mxu1 %v2883_v19  ;;  %v1357_v56 = vld [vmem:[#allocation2 + $0x4] sm:$0xc] }
 0x10b   : > { %v1376_v1 = vunpack.c.l.b16 %v1357_v56  ;;  %v1082_v56 = vrot.slane %v3468_v49, 1 }
 0x10c   : > { %v482_v3 = vmax.f32 %v467_v0, 0.0  ;;  %v1223_v4 = vsel %vm1206_vm5, %v1214_v15, %v1222_v53 }
 0x10d   : > { %v1377_v9 = vpack.c.b16 %v1061_v21, %v1376_v1  ;;  %v1234_v21 = vshrl.u32 %v3468_v49, 16 }
 0x10e   : > { %v573_v11 = vmul.f32 %v559_v8, %v482_v3  ;;  %v2889_v8 = vld [vmem:[%s3696_s4 + $0x220] sm:$0xff] }
 0x10f   : > { %1912 = vmatpush.bf16.msra.mxu2 %v2889_v8  ;;  %v1236_v19 = vrot.slane %v1234_v21, 1 }
 0x110   : > { %v586_v13 = vpack.c.bf16 %v573_v11, %v573_v11 }
 0x111   : > { %v3425_v16 = vld [vmem:[#allocation2 + $0x28] sm:$0xff]  ;;  %v468_v20 = vpop.f32.mrf.mxu0 }
 0x112   : > { %v626_v17 = vld [vmem:[#allocation2 + $0x28] sm:$0x1]  ;;  %599 = vst [vmem:[#allocation2 + $0x30] sm:$0xf] %v586_v13  ;;  %1321 = vmatmul.bf16.vlgmr.msrb.gmra.mxu2 %v1223_v4  ;;  %v1550_v25 = vrot.slane %v3425_v16, 2  ;;  %v1852_v28 = vrot.slane %v3425_v16, 3 }
 0x113   : > { %v665_v23 = vunpack.c.l.b16 %v626_v17  ;;  %v1709_v48 = vshrl.u32 %v3425_v16, 16  ;;  %v1712_v52 = vshll.u32 %v3425_v16, 16  ;;  %v1380_v13 = vrot.slane %v3369_v24, 2  ;;  %v2888_v24 = vld [vmem:[%s3696_s4 + $0x218] sm:$0xff]  ;;  %v2898_v16 = vld [vmem:[%s3698_s6 + $0x28] sm:$0xff] }
 0x114   : > { %v1551_v29 = vsel %vm1378_vm2, %v1548_v33, %v1550_v25  ;;  %v1227_v33 = vrot.slane %v1225_v30, 1  ;;  %v3448_v51 = vsel %vm1844_vm3, %v1850_v57, %v1852_v28  ;;  %v1237_v17 = vshll.u32 %v3468_v49, 16  ;;  %1913 = vmatpush.bf16.msra.mxu2 %v2888_v24 }
 0x115   : > { %v671_v26 = vpack.c.b16 %v665_v23, %v665_v23  ;;  %v1711_v58 = vrot.slane %v1709_v48, 2  ;;  %v1714_v59 = vrot.slane %v1712_v52, 3  ;;  %v1077_v4 = vrot.slane %v3378_v31, 1  ;;  %v2881_v23 = vld [vmem:[%s3696_s4 + $0x1e0] sm:$0xff] }
 0x116   : > { %1630 = vmatmul.bf16.gmra.mxu0 %v1551_v29  ;;  %v1231_v60 = vor.u32 %v1230_v47, %v1227_v33  ;;  %v2880_v29 = vld [vmem:[%s3696_s4 + $0x1d8] sm:$0xff]  ;;  %v2886_v47 = vld [vmem:[%s3696_s4 + $0x208] sm:$0xff] }
 0x117   : > { %v922_v34 = vrot.slane %v671_v26, 1  ;;  %v713_v37 = vshll.u32 %v671_v26, 16  ;;  %v1715_v61 = vor.u32 %v1714_v59, %v1711_v58  ;;  %v1239_v26 = vrot.slane %v1237_v17, 2  ;;  %v1031_v17 = vld [vmem:[#allocation2 + $0x2c] sm:$0x1] }
 0x118   : > { %v1232_v3 = vsel %vm1206_vm5, %v1222_v53, %v1231_v60  ;;  %v1379_v53 = vrot.slane %v1377_v9, 2 }
 0x119   : > { %v923_v39 = vsel %vm912_vm0, %v920_v32, %v922_v34  ;;  %v715_v41 = vrot.slane %v713_v37, 1  ;;  %v1497_v42 = vld [vmem:[#allocation2 + $0x30] sm:$0x3]  ;;  %v2882_v32 = vld [vmem:[%s3696_s4 + $0x1e8] sm:$0xff]  ;;  %v3463_v5 = vsel %vm1672_vm4, %v1706_v10, %v1715_v61  ;;  %v1240_v31 = vor.u32 %v1239_v26, %v1236_v19 }
 0x11a   : > { %1005 = vmatmul.bf16.gmra.mxu3 %v923_v39  ;;  %v1651_v43 = vld [vmem:[#allocation2 + $0x30] sm:$0x7]  ;;  %v1536_v50 = vunpack.c.l.b16 %v1497_v42  ;;  %1781 = vmatpush.bf16.msra.mxu1 %v2882_v32  ;;  %v1381_v20 = vsel %vm1378_vm2, %v1379_v53, %v1380_v13  ;;  %v3494_v34 = vld [vmem:[#allocation2 + $0x24] sm:$0xff]  ;;  %v1080_v37 = vrot.slane %v3427_v18, 1 }
 0x11b   : > { %v716_v44 = vsel %vm672_vm1, %v711_v40, %v715_v41  ;;  %v1670_v46 = vunpack.c.l.b16 %v1651_v43  ;;  %v1241_v30 = vsel %vm1206_vm5, %v1231_v60, %v1240_v31  ;;  %v1243_v38 = vshrl.u32 %v3494_v34, 16  ;;  %v2887_v41 = vld [vmem:[%s3696_s4 + $0x210] sm:$0xff]  ;;  %v2885_v32 = vld [vmem:[%s3696_s4 + $0x200] sm:$0xff]  ;;  %v2878_v60 = vld [vmem:[%s3696_s4 + $0x1c8] sm:$0xff] }
 0x11c   : > { %798 = vmatmul.bf16.gmra.mxu1 %v716_v44  ;;  %v1542_v55 = vpack.c.b16 %v1536_v50, %v1536_v50  ;;  %v1246_v39 = vshll.u32 %v3494_v34, 16  ;;  %v1383_v40 = vsel %vm1378_vm2, %v1380_v13, %v1382_v36  ;;  %v1081_v33 = vsel %vm912_vm0, %v1078_v54, %v1080_v37  ;;  %1914 = vmatpush.bf16.msra.mxu2 %v2887_v41  ;;  %v1185_v44 = vld [vmem:[#allocation2 + $0x2c] sm:$0x3]  ;;  %v2879_v18 = vld [vmem:[%s3696_s4 + $0x1d0] sm:$0xff] }
 0x11d   : > { %v3458_v57 = vpack.c.b16 %v1670_v46, %v1670_v46  ;;  %v1245_v42 = vrot.slane %v1243_v38, 1  ;;  %v1204_v27 = vunpack.c.l.b16 %v1185_v44  ;;  %v1386_v9 = vrot.slane %v3494_v34, 2 }
 0x11e   : > { %v1552_v2 = vrot.slane %v1542_v55, 2  ;;  %1782 = vmatpush.bf16.msra.mxu1 %v2881_v23  ;;  %v1248_v43 = vrot.slane %v1246_v39, 2  ;;  %v1384_v55 = vrot.slane %v3468_v49, 2  ;;  %v1084_v13 = vrot.slane %v3494_v34, 1 }
 0x11f   : > { %v1718_v62 = vshrl.u32 %v3458_v57, 16  ;;  %v1721_v0 = vshll.u32 %v3458_v57, 16  ;;  %v1205_v48 = vpack.c.b16 %v1204_v27, %v1204_v27 }
 0x120   : > { %v1553_v10 = vsel %vm1378_vm2, %v1550_v25, %v1552_v2  ;;  %v1079_v25 = vsel %vm912_vm0, %v1077_v4, %v1078_v54  ;;  %v1249_v50 = vor.u32 %v1248_v43, %v1245_v42  ;;  %1915 = vmatpush.bf16.msra.mxu2 %v2886_v47  ;;  %v1085_v21 = vsel %vm912_vm0, %v1082_v56, %v1084_v13 }
 0x121   : > { %v1720_v6 = vrot.slane %v1718_v62, 2  ;;  %v1723_v7 = vrot.slane %v1721_v0, 3  ;;  %v1252_v58 = vshrl.u32 %v1205_v48, 16  ;;  %v1255_v59 = vshll.u32 %v1205_v48, 16 }
 0x122   : > { %1326 = vmatmul.bf16.gmra.mxu2 %v1232_v3  ;;  %1783 = vmatpush.bf16.msra.mxu1 %v2880_v29  ;;  %v1250_v46 = vsel %vm1206_vm5, %v1240_v31, %v1249_v50  ;;  %v1083_v62 = vsel %vm912_vm0, %v1080_v37, %v1082_v56  ;;  %v1388_v24 = vrot.slane %v1205_v48, 2 }
 0x123   : > { %v1724_v11 = vor.u32 %v1723_v7, %v1720_v6  ;;  %v1254_v0 = vrot.slane %v1252_v58, 1  ;;  %v1257_v1 = vrot.slane %v1255_v59, 2  ;;  %v2877_v7 = vld [vmem:[%s3696_s4 + $0x1c0] sm:$0xff] }
 0x124   : > { %1916 = vmatpush.bf16.msra.mxu2 %v2885_v32 }
 0x125   : > { %v3476_v15 = vsel %vm1672_vm4, %v1715_v61, %v1724_v11  ;;  %v1385_v61 = vsel %vm1378_vm2, %v1382_v36, %v1384_v55  ;;  %v1258_v6 = vor.u32 %v1257_v1, %v1254_v0  ;;  %v1389_v36 = vsel %vm1378_vm2, %v1386_v9, %v1388_v24 }
 0x126   : > { %1635 = vmatmul.bf16.gmra.mxu0 %v1553_v10  ;;  %1784 = vmatpush.bf16.msra.mxu1 %v2879_v18  ;;  %v1387_v10 = vsel %vm1378_vm2, %v1384_v55, %v1386_v9 }
 0x127   : > { %v1259_v3 = vsel %vm1206_vm5, %v1249_v50, %v1258_v6 }
 0x12a   : > { %1451 = vmatmul.bf16.vlgmr.msrb.gmra.mxu3 %v1381_v20  ;;  %1785 = vmatpush.bf16.msra.mxu1 %v2878_v60 }
 0x12c   : > { %1149 = vmatmul.bf16.vlgmr.msrb.gmra.mxu1 %v1079_v25  ;;  %v1070_v25 = vunpack.c.l.b16 %v1031_v17 }
 0x12e   : > { %1786 = vmatpush.bf16.msra.mxu1 %v2877_v7  ;;  %v1076_v26 = vpack.c.b16 %v1070_v25, %v1070_v25  ;;  %v1854_v7 = vrot.slane %v3458_v57, 3 }
 0x130   : > { %v1086_v34 = vrot.slane %v1076_v26, 1 }
 0x132   : > { %1331 = vmatmul.bf16.gmra.mxu2 %v1241_v30  ;;  %v1087_v39 = vsel %vm912_vm0, %v1084_v13, %v1086_v34 }
 0x13a   : > { %1456 = vmatmul.bf16.gmra.mxu3 %v1383_v40 }
 0x13c   : > { %1154 = vmatmul.bf16.gmra.mxu1 %v1081_v33 }
 0x13d   : > { %v866_v52 = vpop.f32.mrf.mxu2 }
 0x142   : > { %1336 = vmatmul.bf16.gmra.mxu2 %v1250_v46 }
 0x145   : > { %v868_v2 = vpop.f32.mrf.mxu2 }
 0x14a   : > { %1461 = vmatmul.bf16.gmra.mxu3 %v1385_v61 }
 0x14c   : > { %1159 = vmatmul.bf16.gmra.mxu1 %v1083_v62 }
 0x152   : > { %1341 = vmatmul.bf16.gmra.mxu2 %v1259_v3 }
 0x154   : > { %v779_v49 = vpop.f32.mrf.mxu1 }
 0x155   : > { %v867_v8 = vadd.f32 %v866_v52, %v779_v49  ;;  %v871_v11 = vpop.f32.mrf.mxu2 }
 0x158   : > { %v986_v53 = vpop.f32.mrf.mxu3 }
 0x159   : > { %v3529_v54 = vadd.f32 %v986_v53, %v867_v8  ;;  %v2899_v8 = vld [vmem:[%s3698_s6 + $0x30] sm:$0xff] }
 0x15a   : > { %1466 = vmatmul.bf16.gmra.mxu3 %v1387_v10 }
 0x15c   : > { %1164 = vmatmul.bf16.gmra.mxu1 %v1085_v21  ;;  %v781_v20 = vpop.f32.mrf.mxu1 }
 0x15d   : > { %v3532_v4 = vadd.f32 %v868_v2, %v781_v20  ;;  %v873_v23 = vpop.f32.mrf.mxu2 }
 0x160   : > { %v3534_v19 = vpop.f32.mrf.mxu3 }
 0x162   : > { %1917 = vmatmul.bf16.vlgmr.msra.gmra.mxu2 %v3288_v35 }
 0x164   : > { %v784_v29 = vpop.f32.mrf.mxu1 }
 0x165   : > { %v872_v31 = vadd.f32 %v871_v11, %v784_v29  ;;  %v876_v30 = vpop.f32.mrf.mxu2 }
 0x168   : > { %v991_v37 = vpop.f32.mrf.mxu3 }
 0x169   : > { %v3538_v38 = vadd.f32 %v991_v37, %v872_v31  ;;  %v2896_v31 = vld [vmem:[%s3698_s6 + $0x18] sm:$0xff] }
 0x16a   : > { %1471 = vmatmul.bf16.gmra.mxu3 %v1389_v36 }
 0x16c   : > { %1169 = vmatmul.bf16.gmra.mxu1 %v1087_v39  ;;  %v786_v40 = vpop.f32.mrf.mxu1 }
 0x16d   : > { %v3541_v41 = vadd.f32 %v873_v23, %v786_v40  ;;  %v878_v33 = vpop.f32.mrf.mxu2 }
 0x170   : > { %v3543_v42 = vpop.f32.mrf.mxu3 }
 0x172   : > { %1922 = vmatmul.bf16.gmra.mxu2 %v3350_v14 }
 0x174   : > { %v789_v35 = vpop.f32.mrf.mxu1 }
 0x175   : > { %v877_v43 = vadd.f32 %v876_v30, %v789_v35  ;;  %v881_v44 = vpop.f32.mrf.mxu2 }
 0x178   : > { %v996_v18 = vpop.f32.mrf.mxu3 }
 0x179   : > { %v3546_v47 = vadd.f32 %v996_v18, %v877_v43  ;;  %v2894_v43 = vld [vmem:[%s3698_s6 + $0x8] sm:$0xff] }
 0x17c   : > { %1787 = vmatmul.bf16.vlgmr.msra.gmra.mxu1 %v3304_v45  ;;  %v791_v50 = vpop.f32.mrf.mxu1 }
 0x17d   : > { %v3549_v27 = vadd.f32 %v878_v33, %v791_v50  ;;  %v883_v32 = vpop.f32.mrf.mxu2 }
 0x180   : > { %v3551_v46 = vpop.f32.mrf.mxu3 }
 0x181   : > { %v1016_v40 = vadd.f32 %v3551_v46, %v3549_v27 }
 0x182   : > { %1927 = vmatmul.bf16.gmra.mxu2 %v3412_v63  ;;  %v2900_v63 = vld [vmem:[%s3698_s6 + $0x38] sm:$0xff] }
 0x183   : > { %2072 = vmatpush.bf16.msra.mxu3 %v2900_v63 }
 0x184   : > { %v794_v48 = vpop.f32.mrf.mxu1 }
 0x185   : > { %v882_v52 = vadd.f32 %v881_v44, %v794_v48  ;;  %v886_v55 = vpop.f32.mrf.mxu2 }
 0x187   : > { %2073 = vmatpush.bf16.msra.mxu3 %v2899_v8 }
 0x188   : > { %v1001_v14 = vpop.f32.mrf.mxu3 }
 0x189   : > { %v3554_v56 = vadd.f32 %v1001_v14, %v882_v52  ;;  %v1616_v52 = vpop.f32.mrf.mxu0 }
 0x18b   : > { %2074 = vmatpush.bf16.msra.mxu3 %v2898_v16 }
 0x18c   : > { %1792 = vmatmul.bf16.gmra.mxu1 %v3364_v22  ;;  %v796_v58 = vpop.f32.mrf.mxu1 }
 0x18d   : > { %v884_v59 = vadd.f32 %v883_v32, %v796_v58  ;;  %v888_v60 = vpop.f32.mrf.mxu2 }
 0x190   : > { %v1003_v45 = vpop.f32.mrf.mxu3 }
 0x191   : > { %v3557_v61 = vadd.f32 %v1003_v45, %v884_v59  ;;  %v1618_v45 = vpop.f32.mrf.mxu0 }
 0x192   : > { %1932 = vmatmul.bf16.gmra.mxu2 %v3448_v51  ;;  %v1855_v51 = vsel %vm1844_vm3, %v1852_v28, %v1854_v7  ;;  %v1012_v28 = vadd.f32 %v3534_v19, %v3532_v4  ;;  %v1014_v4 = vadd.f32 %v3543_v42, %v3541_v41 }
 0x195   : > { %v1322_v62 = vpop.f32.mrf.mxu2 }
 0x199   : > { %v799_v0 = vpop.f32.mrf.mxu1 }
 0x19a   : > { %v887_v1 = vadd.f32 %v886_v55, %v799_v0 }
 0x19c   : > { %1797 = vmatmul.bf16.gmra.mxu1 %v3423_v12 }
 0x19d   : > { %v1006_v2 = vpop.f32.mrf.mxu3  ;;  %v1324_v22 = vpop.f32.mrf.mxu2 }
 0x19e   : > { %v3564_v6 = vadd.f32 %v1006_v2, %v887_v1 }
 0x1a1   : > { %v801_v3 = vpop.f32.mrf.mxu1 }
 0x1a2   : > { %v889_v9 = vadd.f32 %v888_v60, %v801_v3  ;;  %1937 = vmatmul.bf16.gmra.mxu2 %v1855_v51  ;;  %v2893_v60 = vld [vmem:[%s3698_s6] sm:$0xff] }
 0x1a5   : > { %v1008_v49 = vpop.f32.mrf.mxu3  ;;  %v1327_v11 = vpop.f32.mrf.mxu2 }
 0x1a6   : > { %v1020_v12 = vadd.f32 %v1008_v49, %v889_v9 }
 0x1a9   : > { %v1150_v13 = vpop.f32.mrf.mxu1 }
 0x1aa   : > { %v1175_v10 = vadd.f32 %v1150_v13, %v3529_v54 }
 0x1ac   : > { %1802 = vmatmul.bf16.gmra.mxu1 %v3463_v5  ;;  %v1347_v57 = vadd.f32 %v1322_v62, %v1175_v10  ;;  %v2897_v5 = vld [vmem:[%s3698_s6 + $0x20] sm:$0xff] }
 0x1ad   : > { %v1329_v53 = vpop.f32.mrf.mxu2  ;;  %2075 = vmatpush.bf16.msra.mxu3 %v2897_v5  ;;  %v1452_v50 = vpop.f32.mrf.mxu3 }
 0x1ae   : > { %v1477_v2 = vadd.f32 %v1452_v50, %v1347_v57 }
 0x1b0   : > { %v1641_v3 = vadd.f32 %v1616_v52, %v1477_v2 }
 0x1b1   : > { %v1152_v21 = vpop.f32.mrf.mxu1  ;;  %2076 = vmatpush.bf16.msra.mxu3 %v2896_v31 }
 0x1b2   : > { %v1176_v17 = vadd.f32 %v1152_v21, %v1012_v28 }
 0x1b4   : > { %v1348_v20 = vadd.f32 %v1324_v22, %v1176_v17  ;;  %v1621_v22 = vpop.f32.mrf.mxu0 }
 0x1b5   : > { %v1332_v23 = vpop.f32.mrf.mxu2  ;;  %v1454_v55 = vpop.f32.mrf.mxu3 }
 0x1b6   : > { %v1478_v9 = vadd.f32 %v1454_v55, %v1348_v20 }
 0x1b8   : > { %v1642_v13 = vadd.f32 %v1618_v45, %v1478_v9 }
 0x1b9   : > { %v1155_v25 = vpop.f32.mrf.mxu1 }
 0x1ba   : > { %v1177_v26 = vadd.f32 %v1155_v25, %v3538_v38  ;;  %v2895_v38 = vld [vmem:[%s3698_s6 + $0x10] sm:$0xff] }
 0x1bb   : > { %2077 = vmatpush.bf16.msra.mxu3 %v2895_v38 }
 0x1bc   : > { %1807 = vmatmul.bf16.gmra.mxu1 %v3476_v15  ;;  %v1349_v54 = vadd.f32 %v1327_v11, %v1177_v26  ;;  %v3622_v11 = vld [vmem:[%s3697_s5] ss:$0 sm:$0xff] }
 0x1bd   : > { %v1334_v24 = vpop.f32.mrf.mxu2  ;;  %v1457_v0 = vpop.f32.mrf.mxu3 }
 0x1be   : > { %v1479_v28 = vadd.f32 %v1457_v0, %v1349_v54 }
 0x1bf   : > { %2078 = vmatpush.bf16.msra.mxu3 %v2894_v43 }
 0x1c1   : > { %v1157_v19 = vpop.f32.mrf.mxu1 }
 0x1c2   : > { %v1178_v29 = vadd.f32 %v1157_v19, %v1014_v4 }
 0x1c3   : > { %2079 = vmatpush.bf16.msra.mxu3 %v2893_v60 }
 0x1c4   : > { %v3590_v30 = vadd.f32 %v1329_v53, %v1178_v29  ;;  %v1623_v53 = vpop.f32.mrf.mxu0 }
 0x1c5   : > { %v1337_v34 = vpop.f32.mrf.mxu2 }
 0x1c9   : > { %v1160_v36 = vpop.f32.mrf.mxu1 }
 0x1ca   : > { %v1179_v37 = vadd.f32 %v1160_v36, %v3546_v47 }
 0x1cc   : > { %v3593_v15 = vadd.f32 %v1332_v23, %v1179_v37  ;;  %v1626_v29 = vpop.f32.mrf.mxu0 }
 0x1cd   : > { %v1339_v39 = vpop.f32.mrf.mxu2 }
 0x1d1   : > { %v1162_v41 = vpop.f32.mrf.mxu1 }
 0x1d2   : > { %v1180_v33 = vadd.f32 %v1162_v41, %v1016_v40 }
 0x1d4   : > { %v3600_v42 = vadd.f32 %v1334_v24, %v1180_v33  ;;  %v1643_v24 = vadd.f32 %v1621_v22, %v1479_v28 }
 0x1d5   : > { %v1342_v35 = vpop.f32.mrf.mxu2 }
 0x1d9   : > { %v1165_v44 = vpop.f32.mrf.mxu1 }
 0x1da   : > { %v1181_v18 = vadd.f32 %v1165_v44, %v3554_v56 }
 0x1dc   : > { %v3606_v47 = vadd.f32 %v1337_v34, %v1181_v18 }
 0x1dd   : > { %v1344_v32 = vpop.f32.mrf.mxu2 }
 0x1e1   : > { %v1167_v48 = vpop.f32.mrf.mxu1 }
 0x1e2   : > { %v1182_v27 = vadd.f32 %v1167_v48, %v3557_v61 }
 0x1e4   : > { %v3609_v46 = vadd.f32 %v1339_v39, %v1182_v27 }
 0x1e5   : > { %v1918_v14 = vpop.f32.mrf.mxu2 }
 0x1e9   : > { %v1170_v58 = vpop.f32.mrf.mxu1 }
 0x1ea   : > { %v1183_v59 = vadd.f32 %v1170_v58, %v3564_v6  ;;  %v1459_v6 = vpop.f32.mrf.mxu3 }
 0x1eb   : > { %v1480_v4 = vadd.f32 %v1459_v6, %v3590_v30 }
 0x1ec   : > { %v3615_v56 = vadd.f32 %v1342_v35, %v1183_v59  ;;  %v1628_v35 = vpop.f32.mrf.mxu0 }
 0x1ed   : > { %v1920_v61 = vpop.f32.mrf.mxu2  ;;  %v1644_v36 = vadd.f32 %v1623_v53, %v1480_v4 }
 0x1f1   : > { %v1172_v62 = vpop.f32.mrf.mxu1 }
 0x1f2   : > { %v1184_v1 = vadd.f32 %v1172_v62, %v1020_v12  ;;  %v1462_v21 = vpop.f32.mrf.mxu3 }
 0x1f3   : > { %v1481_v41 = vadd.f32 %v1462_v21, %v3593_v15 }
 0x1f4   : > { %v3617_v63 = vadd.f32 %v1344_v32, %v1184_v1  ;;  %v1631_v58 = vpop.f32.mrf.mxu0 }
 0x1f5   : > { %v1923_v49 = vpop.f32.mrf.mxu2  ;;  %v1645_v50 = vadd.f32 %v1626_v29, %v1481_v41 }
 0x1f9   : > { %v1788_v7 = vpop.f32.mrf.mxu1 }
 0x1fa   : > { %v1813_v51 = vadd.f32 %v1788_v7, %v1641_v3  ;;  %v1464_v31 = vpop.f32.mrf.mxu3 }
 0x1fb   : > { %v1482_v27 = vadd.f32 %v1464_v31, %v3600_v42 }
 0x1fc   : > { %v1943_v8 = vadd.f32 %v1918_v14, %v1813_v51  ;;  %v1633_v9 = vpop.f32.mrf.mxu0 }
 0x1fd   : > { %v1925_v20 = vpop.f32.mrf.mxu2  ;;  %v1646_v14 = vadd.f32 %v1628_v35, %v1482_v27 }
 0x1fe   : > { %v1957_v16 = vadd.f32 %v3622_v11, %v1943_v8 }
 0x200   : > { %v1967_v23 = vmax.f32 %v1957_v16, 0.0 }
 0x201   : > { %v1790_v10 = vpop.f32.mrf.mxu1 }
 0x202   : > { %v1814_v12 = vadd.f32 %v1790_v10, %v1642_v13  ;;  %v1467_v18 = vpop.f32.mrf.mxu3 }
 0x203   : > { %v1483_v1 = vadd.f32 %v1467_v18, %v3606_v47  ;;  %v3646_v18 = vld [vmem:[%s3699_s7] ss:$0 sm:$0xff] }
 0x204   : > { %v1944_v57 = vadd.f32 %v1920_v61, %v1814_v12  ;;  %v1636_v28 = vpop.f32.mrf.mxu0 }
 0x205   : > { %v1928_v37 = vpop.f32.mrf.mxu2  ;;  %v1647_v42 = vadd.f32 %v1631_v58, %v1483_v1 }
 0x206   : > { %v1958_v17 = vadd.f32 %v3622_v11, %v1944_v57 }
 0x208   : > { %v1968_v25 = vmax.f32 %v1958_v17, 0.0 }
 0x209   : > { %v1793_v26 = vpop.f32.mrf.mxu1 }
 0x20a   : > { %v1977_v5 = vpack.c.bf16 %v1968_v25, %v1967_v23  ;;  %v1815_v19 = vadd.f32 %v1793_v26, %v1643_v24  ;;  %v1469_v15 = vpop.f32.mrf.mxu3 }
 0x20b   : > { %v1484_v6 = vadd.f32 %v1469_v15, %v3609_v46 }
 0x20c   : > { %2080 = vmatmul.bf16.vlgmr.msra.gmra.mxu3 %v1977_v5  ;;  %v1945_v34 = vadd.f32 %v1923_v49, %v1815_v19  ;;  %v1638_v29 = vpop.f32.mrf.mxu0 }
 0x20d   : > { %v1930_v48 = vpop.f32.mrf.mxu2  ;;  %v1648_v10 = vadd.f32 %v1633_v9, %v1484_v6  ;;  %v2961_v9 = vld [vmem:[%s3093_s20 + $0x18] sm:$0xff]  }
 0x20e   : > { %v1959_v40 = vadd.f32 %v3622_v11, %v1945_v34 }
 0x210   : > { %v1969_v43 = vmax.f32 %v1959_v40, 0.0 }
 0x211   : > { %v1795_v38 = vpop.f32.mrf.mxu1 }
 0x212   : > { %v1816_v54 = vadd.f32 %v1795_v38, %v1644_v36  ;;  %v1472_v49 = vpop.f32.mrf.mxu3 }
 0x213   : > { %v1485_v47 = vadd.f32 %v1472_v49, %v3615_v56  ;;  %v2945_v49 = vunpack.c.l.bf16 %v2961_v9 }
 0x214   : > { %v1946_v39 = vadd.f32 %v1925_v20, %v1816_v54 }
 0x215   : > { %v1933_v0 = vpop.f32.mrf.mxu2  ;;  %v1649_v46 = vadd.f32 %v1636_v28, %v1485_v47 }
 0x216   : > { %v1960_v33 = vadd.f32 %v3622_v11, %v1946_v39 }
 0x218   : > { %v1970_v44 = vmax.f32 %v1960_v33, 0.0  ;;  %v1998_v33 = vld [vmem:[%s3093_s20 + $0x4] sm:$0xe] }
 0x219   : > { %v1798_v30 = vpop.f32.mrf.mxu1 }
 0x21a   : > { %v1978_v32 = vpack.c.bf16 %v1970_v44, %v1969_v43  ;;  %v1817_v52 = vadd.f32 %v1798_v30, %v1645_v50  ;;  %v1474_v17 = vpop.f32.mrf.mxu3  ;;  %v2009_v43 = vunpack.c.l.bf16 %v1998_v33 }
 0x21b   : > { %v1486_v4 = vadd.f32 %v1474_v17, %v3617_v63  ;;  %v2959_v63 = vld [vmem:[%s3093_s20 + $0x8] sm:$0xff]  }
 0x21c   : > { %2085 = vmatmul.bf16.gmra.mxu3 %v1978_v32  ;;  %v1947_v55 = vadd.f32 %v1928_v37, %v1817_v52  ;;  %v2937_v35 = vunpack.c.l.bf16 %v2959_v63  ;;  %v2118_v44 = vrot.slane %v2009_v43, 3  ;;  %v2938_v32 = vunpack.c.h.bf16 %v2959_v63  ;;  %v2008_v43 = vld [vmem:[%s3093_s20 + $0x2c] sm:$0x3] }
 0x21d   : > { %v1935_v8 = vpop.f32.mrf.mxu2  ;;  %v1650_v31 = vadd.f32 %v1638_v29, %v1486_v4 }
 0x21e   : > { %v1961_v45 = vadd.f32 %v3622_v11, %v1947_v55  ;;  %v2119_v30 = vrot.slane %v2937_v35, 3  ;;  %v2121_v52 = vrot.slane %v2938_v32, 3 }
 0x220   : > { %v1971_v2 = vmax.f32 %v1961_v45, 0.0 }
 0x221   : > { %v1800_v59 = vpop.f32.mrf.mxu1 }
 0x222   : > { %v1818_v60 = vadd.f32 %v1800_v59, %v1646_v14  ;;  %v2960_v14 = vld [vmem:[%s3093_s20 + $0x10] sm:$0xff]   ;;  %v2122_v59 = vsel %vm1844_vm3, %v2119_v30, %v2121_v52 }
 0x224   : > { %v1948_v62 = vadd.f32 %v1930_v48, %v1818_v60  ;;  %v2941_v60 = vunpack.c.l.bf16 %v2960_v14 }
 0x225   : > { %v1938_v25 = vpop.f32.mrf.mxu2 }
 0x226   : > { %v1962_v61 = vadd.f32 %v3622_v11, %v1948_v62  ;;  %v2123_v62 = vrot.slane %v2941_v60, 3 }
 0x228   : > { %v1972_v22 = vmax.f32 %v1962_v61, 0.0  ;;  %v2124_v61 = vsel %vm1844_vm3, %v2121_v52, %v2123_v62 }
 0x229   : > { %v1803_v7 = vpop.f32.mrf.mxu1 }
 0x22a   : > { %v1979_v3 = vpack.c.bf16 %v1972_v22, %v1971_v2  ;;  %v1819_v51 = vadd.f32 %v1803_v7, %v1647_v42  ;;  %v2942_v2 = vunpack.c.h.bf16 %v2960_v14 }
 0x22c   : > { %2090 = vmatmul.bf16.gmra.mxu3 %v1979_v3  ;;  %v1949_v13 = vadd.f32 %v1933_v0, %v1819_v51  ;;  %v2125_v42 = vrot.slane %v2942_v2, 3 }
 0x22d   : > { %v1940_v37 = vpop.f32.mrf.mxu2 }
 0x22e   : > { %v1963_v16 = vadd.f32 %v3622_v11, %v1949_v13  ;;  %v2126_v51 = vsel %vm1844_vm3, %v2123_v62, %v2125_v42 }
 0x230   : > { %v1973_v20 = vmax.f32 %v1963_v16, 0.0  ;;  %v2946_v16 = vunpack.c.h.bf16 %v2961_v9 }
 0x231   : > { %v1805_v12 = vpop.f32.mrf.mxu1 }
 0x232   : > { %v1820_v53 = vadd.f32 %v1805_v12, %v1648_v10  ;;  %v2127_v10 = vrot.slane %v2945_v49, 3 }
 0x234   : > { %v1950_v57 = vadd.f32 %v1935_v8, %v1820_v53  ;;  %v2128_v47 = vsel %vm1844_vm3, %v2125_v42, %v2127_v10 }
 0x236   : > { %v1964_v21 = vadd.f32 %v3622_v11, %v1950_v57 }
 0x238   : > { %v1974_v23 = vmax.f32 %v1964_v21, 0.0  ;;  %v2129_v21 = vrot.slane %v2946_v16, 3 }
 0x239   : > { %v1808_v26 = vpop.f32.mrf.mxu1 }
 0x23a   : > { %v1821_v5 = vadd.f32 %v1808_v26, %v1649_v46  ;;  %v1980_v24 = vpack.c.bf16 %v1974_v23, %v1973_v20  ;;  %v2962_v20 = vld [vmem:[%s3093_s20 + $0x20] sm:$0xff]   ;;  %v2130_v46 = vsel %vm1844_vm3, %v2127_v10, %v2129_v21 }
 0x23b   : > { %v2950_v29 = vunpack.c.h.bf16 %v2962_v20 }
 0x23c   : > { %v1951_v19 = vadd.f32 %v1938_v25, %v1821_v5  ;;  %2095 = vmatmul.bf16.gmra.mxu3 %v1980_v24  ;;  %v2949_v25 = vunpack.c.l.bf16 %v2962_v20 }
 0x23e   : > { %v1965_v56 = vadd.f32 %v3622_v11, %v1951_v19  ;;  %v2131_v24 = vrot.slane %v2949_v25, 3 }
 0x240   : > { %v1975_v39 = vmax.f32 %v1965_v56, 0.0  ;;  %v2132_v56 = vsel %vm1844_vm3, %v2129_v21, %v2131_v24 }
 0x241   : > { %v1810_v34 = vpop.f32.mrf.mxu1 }
 0x242   : > { %v1822_v36 = vadd.f32 %v1810_v34, %v1650_v31 }
 0x244   : > { %v1952_v38 = vadd.f32 %v1940_v37, %v1822_v36  ;;  %v2133_v36 = vrot.slane %v2950_v29, 3 }
 0x246   : > { %v1966_v54 = vadd.f32 %v3622_v11, %v1952_v38  ;;  %v2120_v11 = vsel %vm1844_vm3, %v2118_v44, %v2119_v30  ;;  %v2007_v38 = vld [vmem:[%s3093_s20 + $0x28] sm:$0xf] }
 0x248   : > { %v1976_v40 = vmax.f32 %v1966_v54, 0.0 }
 0x24a   : > { %v1981_v41 = vpack.c.bf16 %v1976_v40, %v1975_v39  ;;  %v2134_v39 = vsel %vm1844_vm3, %v2131_v24, %v2133_v36  ;;  %v2018_v40 = vunpack.c.l.bf16 %v2007_v38 }
 0x24c   : > { %2100 = vmatmul.bf16.gmra.mxu3 %v1981_v41  ;;  %v2135_v63 = vrot.slane %v2018_v40, 3 }
 0x24e   : > { %v2136_v30 = vsel %vm1844_vm3, %v2133_v36, %v2135_v63 }
 0x28f   : > { %v2081_v50 = vpop.f32.mrf.mxu3 }
 0x290   : > { %v2082_v48 = vadd.f32 %v3646_v18, %v2081_v50  ;;  %v2019_v50 = vunpack.c.l.bf16 %v2008_v43 }
 0x292   : > { %v2149_v27 = vadd.f32 %v2120_v11, %v2082_v48  ;;  %v2137_v48 = vrot.slane %v2019_v50, 3 }
 0x294   : > { %v2159_v55 = vmax.f32 %v2149_v27, 0.0 }
 0x296   : > { %2169 = vst [vmem:[%s3654_s11] sm:$0xff] %v2159_v55  ;;  %v2138_v55 = vsel %vm1844_vm3, %v2135_v63, %v2137_v48 }
 0x297   : > { %v2083_v58 = vpop.f32.mrf.mxu3 }
 0x298   : > { %v2084_v15 = vadd.f32 %v3646_v18, %v2083_v58 }
 0x29a   : > { %v2150_v45 = vadd.f32 %v2122_v59, %v2084_v15 }
 0x29c   : > { %v2160_v0 = vmax.f32 %v2150_v45, 0.0 }
 0x29e   : > { %2170 = vst [vmem:[%s3654_s11 + $0x8] sm:$0xff] %v2160_v0 }
 0x29f   : > { %v2086_v1 = vpop.f32.mrf.mxu3 }
 0x2a0   : > { %v2087_v22 = vadd.f32 %v3646_v18, %v2086_v1 }
 0x2a2   : > { %v2151_v7 = vadd.f32 %v2124_v61, %v2087_v22 }
 0x2a4   : > { %v2161_v3 = vmax.f32 %v2151_v7, 0.0 }
 0x2a6   : > { %2171 = vst [vmem:[%s3654_s11 + $0x10] sm:$0xff] %v2161_v3 }
 0x2a7   : > { %v2088_v6 = vpop.f32.mrf.mxu3 }
 0x2a8   : > { %v2089_v8 = vadd.f32 %v3646_v18, %v2088_v6 }
 0x2aa   : > { %v2152_v13 = vadd.f32 %v2126_v51, %v2089_v8 }
 0x2ac   : > { %v2162_v12 = vmax.f32 %v2152_v13, 0.0 }
 0x2ae   : > { %2172 = vst [vmem:[%s3654_s11 + $0x18] sm:$0xff] %v2162_v12 }
 0x2af   : > { %v2091_v53 = vpop.f32.mrf.mxu3 }
 0x2b0   : > { %v2092_v57 = vadd.f32 %v3646_v18, %v2091_v53 }
 0x2b2   : > { %v2153_v28 = vadd.f32 %v2128_v47, %v2092_v57 }
 0x2b4   : > { %v2163_v17 = vmax.f32 %v2153_v28, 0.0 }
 0x2b6   : > { %2173 = vst [vmem:[%s3654_s11 + $0x20] sm:$0xff] %v2163_v17 }
 0x2b7   : > { %v2093_v23 = vpop.f32.mrf.mxu3 }
 0x2b8   : > { %v2094_v26 = vadd.f32 %v3646_v18, %v2093_v23 }
 0x2ba   : > { %v2154_v5 = vadd.f32 %v2130_v46, %v2094_v26 }
 0x2bc   : > { %v2164_v4 = vmax.f32 %v2154_v5, 0.0 }
 0x2be   : > { %2174 = vst [vmem:[%s3654_s11 + $0x28] sm:$0xff] %v2164_v4 }
 0x2bf   : > { %v2096_v19 = vpop.f32.mrf.mxu3 }
 0x2c0   : > { %v2097_v31 = vadd.f32 %v3646_v18, %v2096_v19 }
 0x2c2   : > { %v2155_v34 = vadd.f32 %v2132_v56, %v2097_v31 }
 0x2c4   : > { %v2165_v37 = vmax.f32 %v2155_v34, 0.0 }
 0x2c6   : > { %2175 = vst [vmem:[%s3654_s11 + $0x30] sm:$0xff] %v2165_v37 }
 0x2c7   : > { %v2098_v54 = vpop.f32.mrf.mxu3 }
 0x2c8   : > { %v2099_v41 = vadd.f32 %v3646_v18, %v2098_v54 }
 0x2ca   : > { %v2156_v33 = vadd.f32 %v2134_v39, %v2099_v41 }
 0x2cc   : > { %v2166_v35 = vmax.f32 %v2156_v33, 0.0 }
 0x2ce   : > { %2176 = vst [vmem:[%s3654_s11 + $0x38] sm:$0xff] %v2166_v35 }
 0x2cf   : > { %v2101_v44 = vpop.f32.mrf.mxu3 }
 0x2d0   : > { %v2102_v11 = vadd.f32 %v3646_v18, %v2101_v44 }
 0x2d2   : > { %v2157_v32 = vadd.f32 %v2136_v30, %v2102_v11 }
 0x2d4   : > { %v2167_v27 = vmax.f32 %v2157_v32, 0.0 }
 0x2d6   : > { %2177 = vst [vmem:[%s3654_s11 + $0x40] sm:$0xff] %v2167_v27 }
 0x2d7   : > { %v2103_v52 = vpop.f32.mrf.mxu3 }
 0x2d8   : > { %v2104_v14 = vadd.f32 %v3646_v18, %v2103_v52 }
 0x2da   : > { %v2158_v58 = vadd.f32 %v2138_v55, %v2104_v14 }
 0x2dc   : > { %v2168_v59 = vmax.f32 %v2158_v58, 0.0 }
 0x2de   : > { %2178 = vst [vmem:[%s3654_s11 + $0x48] sm:$0xff] %v2168_v59 }
 0x2df PF: > { %s18_s27 = sadd.s32 1, %s2986_s27  }
 0x2e0   : > { %p15_p4 = scmp.ge.s32.totalorder %s18_s27, 4  }
 0x2e2   :  { %17 = sbr.rel (!%p15_p4) target bundleno = 1 (0x1), region = 90 }

</bundles_post_ra>
